<compile_context>
chip_gen: v5e
topology: v5e:2x2
jax: 0.10.0
libtpu: 0.0.40
codegen_flags: <defaults>
</compile_context>

<pallas_src>
import numpy as np
import jax
import jax.numpy as jnp
from jax.experimental import pallas as pl
from jax.experimental.pallas import tpu as pltpu

HIDDEN = 6  # width of the tiny Fy / Ry MLPs (Linear(1,6) -> ReLU -> Linear(6,1))

# SMEM scalar-table layout (48 x f32)
_LF, _LR, _CM1, _CM2, _MASS, _DT_MASS, _DT_IZ, _RXW, _RXB, _FYB2, _RYB2 = range(11)
_FY_W1, _FY_B1, _FY_W2 = 12, 18, 24
_RY_W1, _RY_B1, _RY_W2 = 30, 36, 42


def dynamic_model_kernel(scal_ref, x_ref, o_ref):
    """scal_ref: (48,) f32 SMEM scalars; x_ref: (8, TB) f32 VMEM input tile;
    o_ref: (3, TB) f32 VMEM output tile."""
    lf = scal_ref[_LF]
    lr = scal_ref[_LR]
    Cm1 = scal_ref[_CM1]
    Cm2 = scal_ref[_CM2]
    mass = scal_ref[_MASS]
    dt_over_mass = scal_ref[_DT_MASS]
    dt_over_Iz = scal_ref[_DT_IZ]
    rx_w = scal_ref[_RXW]
    rx_b = scal_ref[_RXB]
    fy_b2 = scal_ref[_FYB2]
    ry_b2 = scal_ref[_RYB2]

    # Hoist the 36 tiny-MLP scalars out of the (unrolled) refinement loop.
    fy_w1 = [scal_ref[_FY_W1 + k] for k in range(HIDDEN)]
    fy_b1 = [scal_ref[_FY_B1 + k] for k in range(HIDDEN)]
    fy_w2 = [scal_ref[_FY_W2 + k] for k in range(HIDDEN)]
    ry_w1 = [scal_ref[_RY_W1 + k] for k in range(HIDDEN)]
    ry_b1 = [scal_ref[_RY_B1 + k] for k in range(HIDDEN)]
    ry_w2 = [scal_ref[_RY_W2 + k] for k in range(HIDDEN)]

    pwm = x_ref[0:1, :]
    theta = x_ref[1:2, :]
    vx0 = x_ref[2:3, :]
    vy0 = x_ref[3:4, :]
    w0 = x_ref[4:5, :]

    sin_t = jnp.sin(theta)
    cos_t = jnp.cos(theta)

    def tiny_mlp(alpha, w1, b1, w2, b2):
        # Linear(1, H) -> ReLU -> Linear(H, 1), fully unrolled as per-lane FMAs.
        acc = jnp.zeros_like(alpha)
        for k in range(HIDDEN):
            acc = acc + w2[k] * jnp.maximum(w1[k] * alpha + b1[k], 0.0)
        return acc + b2

    d0 = jnp.zeros_like(vx0)   # accumulated d_vx
    d1 = jnp.zeros_like(vx0)   # accumulated d_vy
    d2 = jnp.zeros_like(vx0)   # accumulated d_w

    for _ in range(2):  # two semi-implicit Euler refinement steps (as in torch)
        vx = vx0 + d0
        vy = vy0 + d1
        w = w0 + d2
        alpha_f = theta - jnp.arctan2(w * lf + vy, vx)
        alpha_r = jnp.arctan2(w * lr - vy, vx)
        Ffy = tiny_mlp(alpha_f, fy_w1, fy_b1, fy_w2, fy_b2)
        Fry = tiny_mlp(alpha_r, ry_w1, ry_b1, ry_w2, ry_b2)
        Frx = (Cm1 - Cm2 * vx) * pwm + (rx_w * vx * vx + rx_b)   # Rx(vx^2) + drivetrain
        ffy_cos = Ffy * cos_t
        d0 = d0 + (Frx - Ffy * sin_t + mass * vy * w) * dt_over_mass
        d1 = d1 + (Fry + ffy_cos - mass * vx * w) * dt_over_mass
        d2 = d2 + (ffy_cos * lf - Fry * lr) * dt_over_Iz

    o_ref[0:1, :] = d0
    o_ref[1:2, :] = d1
    o_ref[2:3, :] = d2


def dynamic_model_forward(x, params):
    """x: (B, >=6) array with columns [pwm, deltatheta, theta, vx, vy, w].
    Returns (B, 3) = accumulated [d_vx, d_vy, d_w] (same as the torch module)."""
    x = jnp.asarray(x, jnp.float32)
    B = x.shape[0]

    TB = min(1024, ((B + 127) // 128) * 128)        # lane tile, multiple of 128
    nblk = (B + TB - 1) // TB
    B_pad = nblk * TB

    # TODO(synk): for a memory-bound large-B use case, the caller should store x
    # feature-major (features, B) upstream; this transpose is one extra HBM pass
    # kept only to preserve the (B, 6) PyTorch interface.
    feat = x[:, jnp.array([0, 2, 3, 4, 5])].T                      # (5, B)
    x_t = jnp.zeros((8, B_pad), jnp.float32).at[:5, :B].set(feat)  # (8, B_pad)

    out_t = pl.pallas_call(
        dynamic_model_kernel,
        out_shape=jax.ShapeDtypeStruct((3, B_pad), jnp.float32),
        grid=(nblk,),
        in_specs=[
            pl.BlockSpec(memory_space=pltpu.MemorySpace.SMEM),   # scalar table
            pl.BlockSpec((8, TB), lambda i: (0, i)),             # x tile
        ],
        out_specs=pl.BlockSpec((3, TB), lambda i: (0, i)),
        compiler_params=pltpu.CompilerParams(
            dimension_semantics=("parallel",)),
    )(params["scal"], x_t)
    return out_t[:, :B].T                                          # (B, 3)


def init_params(key, deltat=0.01):
    """Deterministic synthetic init mirroring DynamicModel.__init__ shapes."""
    # ORCA 1:43-scale car constants (control='pwm').
    lf, lr = 0.029, 0.033
    mass, Iz = 0.041, 27.8e-6
    Cm1, Cm2 = 0.287, 0.0545

    k_rxw, k_rxb, k_fw2, k_fb2, k_rw2, k_rb2 = jax.random.split(key, 6)
    # Rx = Linear(1,1): PyTorch default uniform(-1/sqrt(1), 1/sqrt(1))
    rx_w = jax.random.uniform(k_rxw, (), jnp.float32, -1.0, 1.0)
    rx_b = jax.random.uniform(k_rxb, (), jnp.float32, -1.0, 1.0)
    # Fy / Ry first layers: weight filled with 1.0, bias = arange(-0.6, 0.6, 0.2)
    w1 = jnp.ones((HIDDEN,), jnp.float32)
    b1 = (-0.6 + 0.2 * jnp.arange(HIDDEN)).astype(jnp.float32)
    # Fy / Ry second layers Linear(6,1): uniform(-1/sqrt(6), 1/sqrt(6))
    bnd = 1.0 / np.sqrt(HIDDEN)
    fy_w2 = jax.random.uniform(k_fw2, (HIDDEN,), jnp.float32, -bnd, bnd)
    fy_b2 = jax.random.uniform(k_fb2, (), jnp.float32, -bnd, bnd)
    ry_w2 = jax.random.uniform(k_rw2, (HIDDEN,), jnp.float32, -bnd, bnd)
    ry_b2 = jax.random.uniform(k_rb2, (), jnp.float32, -bnd, bnd)

    # 48-wide SMEM scalar table (dt/mass and dt/Iz precomputed on host in f64).
    head = jnp.array([lf, lr, Cm1, Cm2, mass, deltat / mass, deltat / Iz],
                     jnp.float32)
    head = jnp.concatenate(
        [head, jnp.stack([rx_w, rx_b, fy_b2, ry_b2]), jnp.zeros((1,), jnp.float32)])
    scal = jnp.concatenate([head, w1, b1, fy_w2, w1, b1, ry_w2]).astype(jnp.float32)
    assert scal.shape == (48,)

    flat = dict(lf=lf, lr=lr, Cm1=Cm1, Cm2=Cm2, mass=mass, Iz=Iz, deltat=deltat,
                rx_w=rx_w, rx_b=rx_b,
                fy_w1=w1, fy_b1=b1, fy_w2=fy_w2, fy_b2=fy_b2,
                ry_w1=w1, ry_b1=b1, ry_w2=ry_w2, ry_b2=ry_b2)
    return {"scal": scal, "flat": flat}


def reference_forward(x, flat):
    """Pure-JAX replica of DynamicModel.forward (float32) for verification."""
    x = jnp.asarray(x, jnp.float32)
    pwm, theta = x[:, 0], x[:, 2]

    def mlp(a, w1, b1, w2, b2):
        h = jnp.maximum(a[:, None] * w1[None, :] + b1[None, :], 0.0)
        return h @ w2 + b2

    out = jnp.zeros((x.shape[0], 3), jnp.float32)
    for _ in range(2):
        vx = x[:, 3] + out[:, 0]
        vy = x[:, 4] + out[:, 1]
        w = x[:, 5] + out[:, 2]
        alpha_f = theta - jnp.arctan2(w * flat["lf"] + vy, vx)
        alpha_r = jnp.arctan2(w * flat["lr"] - vy, vx)
        Ffy = mlp(alpha_f, flat["fy_w1"], flat["fy_b1"], flat["fy_w2"], flat["fy_b2"])
        Fry = mlp(alpha_r, flat["ry_w1"], flat["ry_b1"], flat["ry_w2"], flat["ry_b2"])
        Frx = (flat["Cm1"] - flat["Cm2"] * vx) * pwm + (flat["rx_w"] * vx * vx + flat["rx_b"])
        vx_dot = (Frx - Ffy * jnp.sin(theta) + flat["mass"] * vy * w) / flat["mass"]
        vy_dot = (Fry + Ffy * jnp.cos(theta) - flat["mass"] * vx * w) / flat["mass"]
        w_dot = (Ffy * flat["lf"] * jnp.cos(theta) - Fry * flat["lr"]) / flat["Iz"]
        out = out + jnp.stack([vx_dot, vy_dot, w_dot], axis=1) * flat["deltat"]
    return out


if __name__ == "__main__":
    key = jax.random.PRNGKey(0)
    k_par, k_x = jax.random.split(key)

    params = init_params(k_par, deltat=0.01)

    B = 8
    # columns: [pwm, deltatheta, theta, vx, vy, w]
    x = jax.random.normal(k_x, (B, 6), jnp.float32) * 0.3
    x = x.at[:, 3].set(jnp.abs(x[:, 3]) + 0.5)   # forward longitudinal speed
    x = x.at[:, 0].set(jnp.abs(x[:, 0]))         # non-negative pwm duty cycle

    out = dynamic_model_forward(x, params)
    out = jax.block_until_ready(out)

    ref = reference_forward(x, params["flat"])
    np.testing.assert_allclose(np.asarray(out), np.asarray(ref), rtol=1e-2, atol=1e-2)

    print("KERNEL_OK")
</pallas_src>

<mosaic_0001>
module attributes {stable_mosaic.version = 11 : i64} {
  func.func @dynamic_model_kernel(%arg0: i32, %arg1: memref<48xf32, #tpu.memory_space<smem>>, %arg2: memref<8x128xf32, #tpu.memory_space<vmem>>, %arg3: memref<3x128xf32, #tpu.memory_space<vmem>>) attributes {dimension_semantics = [#tpu.dimension_semantics<parallel>], iteration_bounds = array<i64: 1>, scalar_prefetch = 0 : i64, scratch_operands = 0 : i64, tpu.core_type = #tpu.core_type<tc>, window_params = [{transform_indices = @transform_0, window_bounds = array<i64: 48>}, {transform_indices = @transform_1, window_bounds = array<i64: 8, 128>}, {transform_indices = @transform_2, window_bounds = array<i64: 3, 128>}]} {
    %c0 = arith.constant 0 : index
    %0 = memref.load %arg1[%c0] : memref<48xf32, #tpu.memory_space<smem>>
    %c1 = arith.constant 1 : index
    %1 = memref.load %arg1[%c1] : memref<48xf32, #tpu.memory_space<smem>>
    %c2 = arith.constant 2 : index
    %2 = memref.load %arg1[%c2] : memref<48xf32, #tpu.memory_space<smem>>
    %c3 = arith.constant 3 : index
    %3 = memref.load %arg1[%c3] : memref<48xf32, #tpu.memory_space<smem>>
    %c4 = arith.constant 4 : index
    %4 = memref.load %arg1[%c4] : memref<48xf32, #tpu.memory_space<smem>>
    %c5 = arith.constant 5 : index
    %5 = memref.load %arg1[%c5] : memref<48xf32, #tpu.memory_space<smem>>
    %c6 = arith.constant 6 : index
    %6 = memref.load %arg1[%c6] : memref<48xf32, #tpu.memory_space<smem>>
    %c7 = arith.constant 7 : index
    %7 = memref.load %arg1[%c7] : memref<48xf32, #tpu.memory_space<smem>>
    %c8 = arith.constant 8 : index
    %8 = memref.load %arg1[%c8] : memref<48xf32, #tpu.memory_space<smem>>
    %c9 = arith.constant 9 : index
    %9 = memref.load %arg1[%c9] : memref<48xf32, #tpu.memory_space<smem>>
    %c10 = arith.constant 10 : index
    %10 = memref.load %arg1[%c10] : memref<48xf32, #tpu.memory_space<smem>>
    %c12 = arith.constant 12 : index
    %11 = memref.load %arg1[%c12] : memref<48xf32, #tpu.memory_space<smem>>
    %c13 = arith.constant 13 : index
    %12 = memref.load %arg1[%c13] : memref<48xf32, #tpu.memory_space<smem>>
    %c14 = arith.constant 14 : index
    %13 = memref.load %arg1[%c14] : memref<48xf32, #tpu.memory_space<smem>>
    %c15 = arith.constant 15 : index
    %14 = memref.load %arg1[%c15] : memref<48xf32, #tpu.memory_space<smem>>
    %c16 = arith.constant 16 : index
    %15 = memref.load %arg1[%c16] : memref<48xf32, #tpu.memory_space<smem>>
    %c17 = arith.constant 17 : index
    %16 = memref.load %arg1[%c17] : memref<48xf32, #tpu.memory_space<smem>>
    %c18 = arith.constant 18 : index
    %17 = memref.load %arg1[%c18] : memref<48xf32, #tpu.memory_space<smem>>
    %c19 = arith.constant 19 : index
    %18 = memref.load %arg1[%c19] : memref<48xf32, #tpu.memory_space<smem>>
    %c20 = arith.constant 20 : index
    %19 = memref.load %arg1[%c20] : memref<48xf32, #tpu.memory_space<smem>>
    %c21 = arith.constant 21 : index
    %20 = memref.load %arg1[%c21] : memref<48xf32, #tpu.memory_space<smem>>
    %c22 = arith.constant 22 : index
    %21 = memref.load %arg1[%c22] : memref<48xf32, #tpu.memory_space<smem>>
    %c23 = arith.constant 23 : index
    %22 = memref.load %arg1[%c23] : memref<48xf32, #tpu.memory_space<smem>>
    %c24 = arith.constant 24 : index
    %23 = memref.load %arg1[%c24] : memref<48xf32, #tpu.memory_space<smem>>
    %c25 = arith.constant 25 : index
    %24 = memref.load %arg1[%c25] : memref<48xf32, #tpu.memory_space<smem>>
    %c26 = arith.constant 26 : index
    %25 = memref.load %arg1[%c26] : memref<48xf32, #tpu.memory_space<smem>>
    %c27 = arith.constant 27 : index
    %26 = memref.load %arg1[%c27] : memref<48xf32, #tpu.memory_space<smem>>
    %c28 = arith.constant 28 : index
    %27 = memref.load %arg1[%c28] : memref<48xf32, #tpu.memory_space<smem>>
    %c29 = arith.constant 29 : index
    %28 = memref.load %arg1[%c29] : memref<48xf32, #tpu.memory_space<smem>>
    %c30 = arith.constant 30 : index
    %29 = memref.load %arg1[%c30] : memref<48xf32, #tpu.memory_space<smem>>
    %c31 = arith.constant 31 : index
    %30 = memref.load %arg1[%c31] : memref<48xf32, #tpu.memory_space<smem>>
    %c32 = arith.constant 32 : index
    %31 = memref.load %arg1[%c32] : memref<48xf32, #tpu.memory_space<smem>>
    %c33 = arith.constant 33 : index
    %32 = memref.load %arg1[%c33] : memref<48xf32, #tpu.memory_space<smem>>
    %c34 = arith.constant 34 : index
    %33 = memref.load %arg1[%c34] : memref<48xf32, #tpu.memory_space<smem>>
    %c35 = arith.constant 35 : index
    %34 = memref.load %arg1[%c35] : memref<48xf32, #tpu.memory_space<smem>>
    %c36 = arith.constant 36 : index
    %35 = memref.load %arg1[%c36] : memref<48xf32, #tpu.memory_space<smem>>
    %c37 = arith.constant 37 : index
    %36 = memref.load %arg1[%c37] : memref<48xf32, #tpu.memory_space<smem>>
    %c38 = arith.constant 38 : index
    %37 = memref.load %arg1[%c38] : memref<48xf32, #tpu.memory_space<smem>>
    %c39 = arith.constant 39 : index
    %38 = memref.load %arg1[%c39] : memref<48xf32, #tpu.memory_space<smem>>
    %c40 = arith.constant 40 : index
    %39 = memref.load %arg1[%c40] : memref<48xf32, #tpu.memory_space<smem>>
    %c41 = arith.constant 41 : index
    %40 = memref.load %arg1[%c41] : memref<48xf32, #tpu.memory_space<smem>>
    %c42 = arith.constant 42 : index
    %41 = memref.load %arg1[%c42] : memref<48xf32, #tpu.memory_space<smem>>
    %c43 = arith.constant 43 : index
    %42 = memref.load %arg1[%c43] : memref<48xf32, #tpu.memory_space<smem>>
    %c44 = arith.constant 44 : index
    %43 = memref.load %arg1[%c44] : memref<48xf32, #tpu.memory_space<smem>>
    %c45 = arith.constant 45 : index
    %44 = memref.load %arg1[%c45] : memref<48xf32, #tpu.memory_space<smem>>
    %c46 = arith.constant 46 : index
    %45 = memref.load %arg1[%c46] : memref<48xf32, #tpu.memory_space<smem>>
    %c47 = arith.constant 47 : index
    %46 = memref.load %arg1[%c47] : memref<48xf32, #tpu.memory_space<smem>>
    %c0_0 = arith.constant 0 : index
    %c0_1 = arith.constant 0 : index
    %47 = vector.load %arg2[%c0_0, %c0_1] : memref<8x128xf32, #tpu.memory_space<vmem>>, vector<1x128xf32>
    %c1_2 = arith.constant 1 : index
    %c0_3 = arith.constant 0 : index
    %48 = vector.load %arg2[%c1_2, %c0_3] : memref<8x128xf32, #tpu.memory_space<vmem>>, vector<1x128xf32>
    %c2_4 = arith.constant 2 : index
    %c0_5 = arith.constant 0 : index
    %49 = vector.load %arg2[%c2_4, %c0_5] : memref<8x128xf32, #tpu.memory_space<vmem>>, vector<1x128xf32>
    %c3_6 = arith.constant 3 : index
    %c0_7 = arith.constant 0 : index
    %50 = vector.load %arg2[%c3_6, %c0_7] : memref<8x128xf32, #tpu.memory_space<vmem>>, vector<1x128xf32>
    %c4_8 = arith.constant 4 : index
    %c0_9 = arith.constant 0 : index
    %51 = vector.load %arg2[%c4_8, %c0_9] : memref<8x128xf32, #tpu.memory_space<vmem>>, vector<1x128xf32>
    %52 = math.sin %48 : vector<1x128xf32>
    %53 = math.cos %48 : vector<1x128xf32>
    %cst = arith.constant 0.000000e+00 : f32
    %54 = vector.broadcast %cst : f32 to vector<1x128xf32>
    %cst_10 = arith.constant 0.000000e+00 : f32
    %55 = vector.broadcast %cst_10 : f32 to vector<1x128xf32>
    %cst_11 = arith.constant 0.000000e+00 : f32
    %56 = vector.broadcast %cst_11 : f32 to vector<1x128xf32>
    %57 = arith.addf %49, %54 : vector<1x128xf32>
    %58 = arith.addf %50, %55 : vector<1x128xf32>
    %59 = arith.addf %51, %56 : vector<1x128xf32>
    %60 = vector.broadcast %0 : f32 to vector<1x128xf32>
    %61 = arith.mulf %59, %60 : vector<1x128xf32>
    %62 = arith.addf %61, %58 : vector<1x128xf32>
    %63 = math.atan2 %62, %57 : vector<1x128xf32>
    %64 = arith.subf %48, %63 : vector<1x128xf32>
    %65 = vector.broadcast %1 : f32 to vector<1x128xf32>
    %66 = arith.mulf %59, %65 : vector<1x128xf32>
    %67 = arith.subf %66, %58 : vector<1x128xf32>
    %68 = math.atan2 %67, %57 : vector<1x128xf32>
    %cst_12 = arith.constant 0.000000e+00 : f32
    %69 = vector.broadcast %cst_12 : f32 to vector<1x128xf32>
    %70 = vector.broadcast %11 : f32 to vector<1x128xf32>
    %71 = arith.mulf %70, %64 : vector<1x128xf32>
    %72 = vector.broadcast %17 : f32 to vector<1x128xf32>
    %73 = arith.addf %71, %72 : vector<1x128xf32>
    %cst_13 = arith.constant 0.000000e+00 : f32
    %74 = vector.broadcast %cst_13 : f32 to vector<1x128xf32>
    %75 = arith.maximumf %73, %74 : vector<1x128xf32>
    %76 = vector.broadcast %23 : f32 to vector<1x128xf32>
    %77 = arith.mulf %76, %75 : vector<1x128xf32>
    %78 = arith.addf %69, %77 : vector<1x128xf32>
    %79 = vector.broadcast %12 : f32 to vector<1x128xf32>
    %80 = arith.mulf %79, %64 : vector<1x128xf32>
    %81 = vector.broadcast %18 : f32 to vector<1x128xf32>
    %82 = arith.addf %80, %81 : vector<1x128xf32>
    %cst_14 = arith.constant 0.000000e+00 : f32
    %83 = vector.broadcast %cst_14 : f32 to vector<1x128xf32>
    %84 = arith.maximumf %82, %83 : vector<1x128xf32>
    %85 = vector.broadcast %24 : f32 to vector<1x128xf32>
    %86 = arith.mulf %85, %84 : vector<1x128xf32>
    %87 = arith.addf %78, %86 : vector<1x128xf32>
    %88 = vector.broadcast %13 : f32 to vector<1x128xf32>
    %89 = arith.mulf %88, %64 : vector<1x128xf32>
    %90 = vector.broadcast %19 : f32 to vector<1x128xf32>
    %91 = arith.addf %89, %90 : vector<1x128xf32>
    %cst_15 = arith.constant 0.000000e+00 : f32
    %92 = vector.broadcast %cst_15 : f32 to vector<1x128xf32>
    %93 = arith.maximumf %91, %92 : vector<1x128xf32>
    %94 = vector.broadcast %25 : f32 to vector<1x128xf32>
    %95 = arith.mulf %94, %93 : vector<1x128xf32>
    %96 = arith.addf %87, %95 : vector<1x128xf32>
    %97 = vector.broadcast %14 : f32 to vector<1x128xf32>
    %98 = arith.mulf %97, %64 : vector<1x128xf32>
    %99 = vector.broadcast %20 : f32 to vector<1x128xf32>
    %100 = arith.addf %98, %99 : vector<1x128xf32>
    %cst_16 = arith.constant 0.000000e+00 : f32
    %101 = vector.broadcast %cst_16 : f32 to vector<1x128xf32>
    %102 = arith.maximumf %100, %101 : vector<1x128xf32>
    %103 = vector.broadcast %26 : f32 to vector<1x128xf32>
    %104 = arith.mulf %103, %102 : vector<1x128xf32>
    %105 = arith.addf %96, %104 : vector<1x128xf32>
    %106 = vector.broadcast %15 : f32 to vector<1x128xf32>
    %107 = arith.mulf %106, %64 : vector<1x128xf32>
    %108 = vector.broadcast %21 : f32 to vector<1x128xf32>
    %109 = arith.addf %107, %108 : vector<1x128xf32>
    %cst_17 = arith.constant 0.000000e+00 : f32
    %110 = vector.broadcast %cst_17 : f32 to vector<1x128xf32>
    %111 = arith.maximumf %109, %110 : vector<1x128xf32>
    %112 = vector.broadcast %27 : f32 to vector<1x128xf32>
    %113 = arith.mulf %112, %111 : vector<1x128xf32>
    %114 = arith.addf %105, %113 : vector<1x128xf32>
    %115 = vector.broadcast %16 : f32 to vector<1x128xf32>
    %116 = arith.mulf %115, %64 : vector<1x128xf32>
    %117 = vector.broadcast %22 : f32 to vector<1x128xf32>
    %118 = arith.addf %116, %117 : vector<1x128xf32>
    %cst_18 = arith.constant 0.000000e+00 : f32
    %119 = vector.broadcast %cst_18 : f32 to vector<1x128xf32>
    %120 = arith.maximumf %118, %119 : vector<1x128xf32>
    %121 = vector.broadcast %28 : f32 to vector<1x128xf32>
    %122 = arith.mulf %121, %120 : vector<1x128xf32>
    %123 = arith.addf %114, %122 : vector<1x128xf32>
    %124 = vector.broadcast %9 : f32 to vector<1x128xf32>
    %125 = arith.addf %123, %124 : vector<1x128xf32>
    %cst_19 = arith.constant 0.000000e+00 : f32
    %126 = vector.broadcast %cst_19 : f32 to vector<1x128xf32>
    %127 = vector.broadcast %29 : f32 to vector<1x128xf32>
    %128 = arith.mulf %127, %68 : vector<1x128xf32>
    %129 = vector.broadcast %35 : f32 to vector<1x128xf32>
    %130 = arith.addf %128, %129 : vector<1x128xf32>
    %cst_20 = arith.constant 0.000000e+00 : f32
    %131 = vector.broadcast %cst_20 : f32 to vector<1x128xf32>
    %132 = arith.maximumf %130, %131 : vector<1x128xf32>
    %133 = vector.broadcast %41 : f32 to vector<1x128xf32>
    %134 = arith.mulf %133, %132 : vector<1x128xf32>
    %135 = arith.addf %126, %134 : vector<1x128xf32>
    %136 = vector.broadcast %30 : f32 to vector<1x128xf32>
    %137 = arith.mulf %136, %68 : vector<1x128xf32>
    %138 = vector.broadcast %36 : f32 to vector<1x128xf32>
    %139 = arith.addf %137, %138 : vector<1x128xf32>
    %cst_21 = arith.constant 0.000000e+00 : f32
    %140 = vector.broadcast %cst_21 : f32 to vector<1x128xf32>
    %141 = arith.maximumf %139, %140 : vector<1x128xf32>
    %142 = vector.broadcast %42 : f32 to vector<1x128xf32>
    %143 = arith.mulf %142, %141 : vector<1x128xf32>
    %144 = arith.addf %135, %143 : vector<1x128xf32>
    %145 = vector.broadcast %31 : f32 to vector<1x128xf32>
    %146 = arith.mulf %145, %68 : vector<1x128xf32>
    %147 = vector.broadcast %37 : f32 to vector<1x128xf32>
    %148 = arith.addf %146, %147 : vector<1x128xf32>
    %cst_22 = arith.constant 0.000000e+00 : f32
    %149 = vector.broadcast %cst_22 : f32 to vector<1x128xf32>
    %150 = arith.maximumf %148, %149 : vector<1x128xf32>
    %151 = vector.broadcast %43 : f32 to vector<1x128xf32>
    %152 = arith.mulf %151, %150 : vector<1x128xf32>
    %153 = arith.addf %144, %152 : vector<1x128xf32>
    %154 = vector.broadcast %32 : f32 to vector<1x128xf32>
    %155 = arith.mulf %154, %68 : vector<1x128xf32>
    %156 = vector.broadcast %38 : f32 to vector<1x128xf32>
    %157 = arith.addf %155, %156 : vector<1x128xf32>
    %cst_23 = arith.constant 0.000000e+00 : f32
    %158 = vector.broadcast %cst_23 : f32 to vector<1x128xf32>
    %159 = arith.maximumf %157, %158 : vector<1x128xf32>
    %160 = vector.broadcast %44 : f32 to vector<1x128xf32>
    %161 = arith.mulf %160, %159 : vector<1x128xf32>
    %162 = arith.addf %153, %161 : vector<1x128xf32>
    %163 = vector.broadcast %33 : f32 to vector<1x128xf32>
    %164 = arith.mulf %163, %68 : vector<1x128xf32>
    %165 = vector.broadcast %39 : f32 to vector<1x128xf32>
    %166 = arith.addf %164, %165 : vector<1x128xf32>
    %cst_24 = arith.constant 0.000000e+00 : f32
    %167 = vector.broadcast %cst_24 : f32 to vector<1x128xf32>
    %168 = arith.maximumf %166, %167 : vector<1x128xf32>
    %169 = vector.broadcast %45 : f32 to vector<1x128xf32>
    %170 = arith.mulf %169, %168 : vector<1x128xf32>
    %171 = arith.addf %162, %170 : vector<1x128xf32>
    %172 = vector.broadcast %34 : f32 to vector<1x128xf32>
    %173 = arith.mulf %172, %68 : vector<1x128xf32>
    %174 = vector.broadcast %40 : f32 to vector<1x128xf32>
    %175 = arith.addf %173, %174 : vector<1x128xf32>
    %cst_25 = arith.constant 0.000000e+00 : f32
    %176 = vector.broadcast %cst_25 : f32 to vector<1x128xf32>
    %177 = arith.maximumf %175, %176 : vector<1x128xf32>
    %178 = vector.broadcast %46 : f32 to vector<1x128xf32>
    %179 = arith.mulf %178, %177 : vector<1x128xf32>
    %180 = arith.addf %171, %179 : vector<1x128xf32>
    %181 = vector.broadcast %10 : f32 to vector<1x128xf32>
    %182 = arith.addf %180, %181 : vector<1x128xf32>
    %183 = vector.broadcast %3 : f32 to vector<1x128xf32>
    %184 = arith.mulf %183, %57 : vector<1x128xf32>
    %185 = vector.broadcast %2 : f32 to vector<1x128xf32>
    %186 = arith.subf %185, %184 : vector<1x128xf32>
    %187 = arith.mulf %186, %47 : vector<1x128xf32>
    %188 = vector.broadcast %7 : f32 to vector<1x128xf32>
    %189 = arith.mulf %188, %57 : vector<1x128xf32>
    %190 = arith.mulf %189, %57 : vector<1x128xf32>
    %191 = vector.broadcast %8 : f32 to vector<1x128xf32>
    %192 = arith.addf %190, %191 : vector<1x128xf32>
    %193 = arith.addf %187, %192 : vector<1x128xf32>
    %194 = arith.mulf %125, %53 : vector<1x128xf32>
    %195 = arith.mulf %125, %52 : vector<1x128xf32>
    %196 = arith.subf %193, %195 : vector<1x128xf32>
    %197 = vector.broadcast %4 : f32 to vector<1x128xf32>
    %198 = arith.mulf %197, %58 : vector<1x128xf32>
    %199 = arith.mulf %198, %59 : vector<1x128xf32>
    %200 = arith.addf %196, %199 : vector<1x128xf32>
    %201 = vector.broadcast %5 : f32 to vector<1x128xf32>
    %202 = arith.mulf %200, %201 : vector<1x128xf32>
    %203 = arith.addf %54, %202 : vector<1x128xf32>
    %204 = arith.addf %182, %194 : vector<1x128xf32>
    %205 = vector.broadcast %4 : f32 to vector<1x128xf32>
    %206 = arith.mulf %205, %57 : vector<1x128xf32>
    %207 = arith.mulf %206, %59 : vector<1x128xf32>
    %208 = arith.subf %204, %207 : vector<1x128xf32>
    %209 = vector.broadcast %5 : f32 to vector<1x128xf32>
    %210 = arith.mulf %208, %209 : vector<1x128xf32>
    %211 = arith.addf %55, %210 : vector<1x128xf32>
    %212 = vector.broadcast %0 : f32 to vector<1x128xf32>
    %213 = arith.mulf %194, %212 : vector<1x128xf32>
    %214 = vector.broadcast %1 : f32 to vector<1x128xf32>
    %215 = arith.mulf %182, %214 : vector<1x128xf32>
    %216 = arith.subf %213, %215 : vector<1x128xf32>
    %217 = vector.broadcast %6 : f32 to vector<1x128xf32>
    %218 = arith.mulf %216, %217 : vector<1x128xf32>
    %219 = arith.addf %56, %218 : vector<1x128xf32>
    %220 = arith.addf %49, %203 : vector<1x128xf32>
    %221 = arith.addf %50, %211 : vector<1x128xf32>
    %222 = arith.addf %51, %219 : vector<1x128xf32>
    %223 = vector.broadcast %0 : f32 to vector<1x128xf32>
    %224 = arith.mulf %222, %223 : vector<1x128xf32>
    %225 = arith.addf %224, %221 : vector<1x128xf32>
    %226 = math.atan2 %225, %220 : vector<1x128xf32>
    %227 = arith.subf %48, %226 : vector<1x128xf32>
    %228 = vector.broadcast %1 : f32 to vector<1x128xf32>
    %229 = arith.mulf %222, %228 : vector<1x128xf32>
    %230 = arith.subf %229, %221 : vector<1x128xf32>
    %231 = math.atan2 %230, %220 : vector<1x128xf32>
    %cst_26 = arith.constant 0.000000e+00 : f32
    %232 = vector.broadcast %cst_26 : f32 to vector<1x128xf32>
    %233 = vector.broadcast %11 : f32 to vector<1x128xf32>
    %234 = arith.mulf %233, %227 : vector<1x128xf32>
    %235 = vector.broadcast %17 : f32 to vector<1x128xf32>
    %236 = arith.addf %234, %235 : vector<1x128xf32>
    %cst_27 = arith.constant 0.000000e+00 : f32
    %237 = vector.broadcast %cst_27 : f32 to vector<1x128xf32>
    %238 = arith.maximumf %236, %237 : vector<1x128xf32>
    %239 = vector.broadcast %23 : f32 to vector<1x128xf32>
    %240 = arith.mulf %239, %238 : vector<1x128xf32>
    %241 = arith.addf %232, %240 : vector<1x128xf32>
    %242 = vector.broadcast %12 : f32 to vector<1x128xf32>
    %243 = arith.mulf %242, %227 : vector<1x128xf32>
    %244 = vector.broadcast %18 : f32 to vector<1x128xf32>
    %245 = arith.addf %243, %244 : vector<1x128xf32>
    %cst_28 = arith.constant 0.000000e+00 : f32
    %246 = vector.broadcast %cst_28 : f32 to vector<1x128xf32>
    %247 = arith.maximumf %245, %246 : vector<1x128xf32>
    %248 = vector.broadcast %24 : f32 to vector<1x128xf32>
    %249 = arith.mulf %248, %247 : vector<1x128xf32>
    %250 = arith.addf %241, %249 : vector<1x128xf32>
    %251 = vector.broadcast %13 : f32 to vector<1x128xf32>
    %252 = arith.mulf %251, %227 : vector<1x128xf32>
    %253 = vector.broadcast %19 : f32 to vector<1x128xf32>
    %254 = arith.addf %252, %253 : vector<1x128xf32>
    %cst_29 = arith.constant 0.000000e+00 : f32
    %255 = vector.broadcast %cst_29 : f32 to vector<1x128xf32>
    %256 = arith.maximumf %254, %255 : vector<1x128xf32>
    %257 = vector.broadcast %25 : f32 to vector<1x128xf32>
    %258 = arith.mulf %257, %256 : vector<1x128xf32>
    %259 = arith.addf %250, %258 : vector<1x128xf32>
    %260 = vector.broadcast %14 : f32 to vector<1x128xf32>
    %261 = arith.mulf %260, %227 : vector<1x128xf32>
    %262 = vector.broadcast %20 : f32 to vector<1x128xf32>
    %263 = arith.addf %261, %262 : vector<1x128xf32>
    %cst_30 = arith.constant 0.000000e+00 : f32
    %264 = vector.broadcast %cst_30 : f32 to vector<1x128xf32>
    %265 = arith.maximumf %263, %264 : vector<1x128xf32>
    %266 = vector.broadcast %26 : f32 to vector<1x128xf32>
    %267 = arith.mulf %266, %265 : vector<1x128xf32>
    %268 = arith.addf %259, %267 : vector<1x128xf32>
    %269 = vector.broadcast %15 : f32 to vector<1x128xf32>
    %270 = arith.mulf %269, %227 : vector<1x128xf32>
    %271 = vector.broadcast %21 : f32 to vector<1x128xf32>
    %272 = arith.addf %270, %271 : vector<1x128xf32>
    %cst_31 = arith.constant 0.000000e+00 : f32
    %273 = vector.broadcast %cst_31 : f32 to vector<1x128xf32>
    %274 = arith.maximumf %272, %273 : vector<1x128xf32>
    %275 = vector.broadcast %27 : f32 to vector<1x128xf32>
    %276 = arith.mulf %275, %274 : vector<1x128xf32>
    %277 = arith.addf %268, %276 : vector<1x128xf32>
    %278 = vector.broadcast %16 : f32 to vector<1x128xf32>
    %279 = arith.mulf %278, %227 : vector<1x128xf32>
    %280 = vector.broadcast %22 : f32 to vector<1x128xf32>
    %281 = arith.addf %279, %280 : vector<1x128xf32>
    %cst_32 = arith.constant 0.000000e+00 : f32
    %282 = vector.broadcast %cst_32 : f32 to vector<1x128xf32>
    %283 = arith.maximumf %281, %282 : vector<1x128xf32>
    %284 = vector.broadcast %28 : f32 to vector<1x128xf32>
    %285 = arith.mulf %284, %283 : vector<1x128xf32>
    %286 = arith.addf %277, %285 : vector<1x128xf32>
    %287 = vector.broadcast %9 : f32 to vector<1x128xf32>
    %288 = arith.addf %286, %287 : vector<1x128xf32>
    %cst_33 = arith.constant 0.000000e+00 : f32
    %289 = vector.broadcast %cst_33 : f32 to vector<1x128xf32>
    %290 = vector.broadcast %29 : f32 to vector<1x128xf32>
    %291 = arith.mulf %290, %231 : vector<1x128xf32>
    %292 = vector.broadcast %35 : f32 to vector<1x128xf32>
    %293 = arith.addf %291, %292 : vector<1x128xf32>
    %cst_34 = arith.constant 0.000000e+00 : f32
    %294 = vector.broadcast %cst_34 : f32 to vector<1x128xf32>
    %295 = arith.maximumf %293, %294 : vector<1x128xf32>
    %296 = vector.broadcast %41 : f32 to vector<1x128xf32>
    %297 = arith.mulf %296, %295 : vector<1x128xf32>
    %298 = arith.addf %289, %297 : vector<1x128xf32>
    %299 = vector.broadcast %30 : f32 to vector<1x128xf32>
    %300 = arith.mulf %299, %231 : vector<1x128xf32>
    %301 = vector.broadcast %36 : f32 to vector<1x128xf32>
    %302 = arith.addf %300, %301 : vector<1x128xf32>
    %cst_35 = arith.constant 0.000000e+00 : f32
    %303 = vector.broadcast %cst_35 : f32 to vector<1x128xf32>
    %304 = arith.maximumf %302, %303 : vector<1x128xf32>
    %305 = vector.broadcast %42 : f32 to vector<1x128xf32>
    %306 = arith.mulf %305, %304 : vector<1x128xf32>
    %307 = arith.addf %298, %306 : vector<1x128xf32>
    %308 = vector.broadcast %31 : f32 to vector<1x128xf32>
    %309 = arith.mulf %308, %231 : vector<1x128xf32>
    %310 = vector.broadcast %37 : f32 to vector<1x128xf32>
    %311 = arith.addf %309, %310 : vector<1x128xf32>
    %cst_36 = arith.constant 0.000000e+00 : f32
    %312 = vector.broadcast %cst_36 : f32 to vector<1x128xf32>
    %313 = arith.maximumf %311, %312 : vector<1x128xf32>
    %314 = vector.broadcast %43 : f32 to vector<1x128xf32>
    %315 = arith.mulf %314, %313 : vector<1x128xf32>
    %316 = arith.addf %307, %315 : vector<1x128xf32>
    %317 = vector.broadcast %32 : f32 to vector<1x128xf32>
    %318 = arith.mulf %317, %231 : vector<1x128xf32>
    %319 = vector.broadcast %38 : f32 to vector<1x128xf32>
    %320 = arith.addf %318, %319 : vector<1x128xf32>
    %cst_37 = arith.constant 0.000000e+00 : f32
    %321 = vector.broadcast %cst_37 : f32 to vector<1x128xf32>
    %322 = arith.maximumf %320, %321 : vector<1x128xf32>
    %323 = vector.broadcast %44 : f32 to vector<1x128xf32>
    %324 = arith.mulf %323, %322 : vector<1x128xf32>
    %325 = arith.addf %316, %324 : vector<1x128xf32>
    %326 = vector.broadcast %33 : f32 to vector<1x128xf32>
    %327 = arith.mulf %326, %231 : vector<1x128xf32>
    %328 = vector.broadcast %39 : f32 to vector<1x128xf32>
    %329 = arith.addf %327, %328 : vector<1x128xf32>
    %cst_38 = arith.constant 0.000000e+00 : f32
    %330 = vector.broadcast %cst_38 : f32 to vector<1x128xf32>
    %331 = arith.maximumf %329, %330 : vector<1x128xf32>
    %332 = vector.broadcast %45 : f32 to vector<1x128xf32>
    %333 = arith.mulf %332, %331 : vector<1x128xf32>
    %334 = arith.addf %325, %333 : vector<1x128xf32>
    %335 = vector.broadcast %34 : f32 to vector<1x128xf32>
    %336 = arith.mulf %335, %231 : vector<1x128xf32>
    %337 = vector.broadcast %40 : f32 to vector<1x128xf32>
    %338 = arith.addf %336, %337 : vector<1x128xf32>
    %cst_39 = arith.constant 0.000000e+00 : f32
    %339 = vector.broadcast %cst_39 : f32 to vector<1x128xf32>
    %340 = arith.maximumf %338, %339 : vector<1x128xf32>
    %341 = vector.broadcast %46 : f32 to vector<1x128xf32>
    %342 = arith.mulf %341, %340 : vector<1x128xf32>
    %343 = arith.addf %334, %342 : vector<1x128xf32>
    %344 = vector.broadcast %10 : f32 to vector<1x128xf32>
    %345 = arith.addf %343, %344 : vector<1x128xf32>
    %346 = vector.broadcast %3 : f32 to vector<1x128xf32>
    %347 = arith.mulf %346, %220 : vector<1x128xf32>
    %348 = vector.broadcast %2 : f32 to vector<1x128xf32>
    %349 = arith.subf %348, %347 : vector<1x128xf32>
    %350 = arith.mulf %349, %47 : vector<1x128xf32>
    %351 = vector.broadcast %7 : f32 to vector<1x128xf32>
    %352 = arith.mulf %351, %220 : vector<1x128xf32>
    %353 = arith.mulf %352, %220 : vector<1x128xf32>
    %354 = vector.broadcast %8 : f32 to vector<1x128xf32>
    %355 = arith.addf %353, %354 : vector<1x128xf32>
    %356 = arith.addf %350, %355 : vector<1x128xf32>
    %357 = arith.mulf %288, %53 : vector<1x128xf32>
    %358 = arith.mulf %288, %52 : vector<1x128xf32>
    %359 = arith.subf %356, %358 : vector<1x128xf32>
    %360 = vector.broadcast %4 : f32 to vector<1x128xf32>
    %361 = arith.mulf %360, %221 : vector<1x128xf32>
    %362 = arith.mulf %361, %222 : vector<1x128xf32>
    %363 = arith.addf %359, %362 : vector<1x128xf32>
    %364 = vector.broadcast %5 : f32 to vector<1x128xf32>
    %365 = arith.mulf %363, %364 : vector<1x128xf32>
    %366 = arith.addf %203, %365 : vector<1x128xf32>
    %367 = arith.addf %345, %357 : vector<1x128xf32>
    %368 = vector.broadcast %4 : f32 to vector<1x128xf32>
    %369 = arith.mulf %368, %220 : vector<1x128xf32>
    %370 = arith.mulf %369, %222 : vector<1x128xf32>
    %371 = arith.subf %367, %370 : vector<1x128xf32>
    %372 = vector.broadcast %5 : f32 to vector<1x128xf32>
    %373 = arith.mulf %371, %372 : vector<1x128xf32>
    %374 = arith.addf %211, %373 : vector<1x128xf32>
    %375 = vector.broadcast %0 : f32 to vector<1x128xf32>
    %376 = arith.mulf %357, %375 : vector<1x128xf32>
    %377 = vector.broadcast %1 : f32 to vector<1x128xf32>
    %378 = arith.mulf %345, %377 : vector<1x128xf32>
    %379 = arith.subf %376, %378 : vector<1x128xf32>
    %380 = vector.broadcast %6 : f32 to vector<1x128xf32>
    %381 = arith.mulf %379, %380 : vector<1x128xf32>
    %382 = arith.addf %219, %381 : vector<1x128xf32>
    %c0_40 = arith.constant 0 : index
    %c0_41 = arith.constant 0 : index
    %383 = vector.load %arg3[%c0_40, %c0_41] : memref<3x128xf32, #tpu.memory_space<vmem>>, vector<1x128xf32>
    tpu.vector_store %arg3[%c0_40, %c0_41], %366 {strides = array<i32>} : memref<3x128xf32, #tpu.memory_space<vmem>>, vector<1x128xf32>,
    %c1_42 = arith.constant 1 : index
    %c0_43 = arith.constant 0 : index
    %384 = vector.load %arg3[%c1_42, %c0_43] : memref<3x128xf32, #tpu.memory_space<vmem>>, vector<1x128xf32>
    tpu.vector_store %arg3[%c1_42, %c0_43], %374 {strides = array<i32>} : memref<3x128xf32, #tpu.memory_space<vmem>>, vector<1x128xf32>,
    %c2_44 = arith.constant 2 : index
    %c0_45 = arith.constant 0 : index
    %385 = vector.load %arg3[%c2_44, %c0_45] : memref<3x128xf32, #tpu.memory_space<vmem>>, vector<1x128xf32>
    tpu.vector_store %arg3[%c2_44, %c0_45], %382 {strides = array<i32>} : memref<3x128xf32, #tpu.memory_space<vmem>>, vector<1x128xf32>,
    return
  }
  func.func @transform_0(%arg0: i32) -> i32 {
    %c0_i32 = arith.constant 0 : i32
    %c0_i32_0 = arith.constant 0 : i32
    return %c0_i32 : i32
  }
  func.func @transform_1(%arg0: i32) -> (i32, i32) {
    %c0_i32 = arith.constant 0 : i32
    %c0_i32_0 = arith.constant 0 : i32
    return %c0_i32, %arg0 : i32, i32
  }
  func.func @transform_2(%arg0: i32) -> (i32, i32) {
    %c0_i32 = arith.constant 0 : i32
    %c0_i32_0 = arith.constant 0 : i32
    return %c0_i32, %arg0 : i32, i32
  }
}

</mosaic_0001>

<bundles_post_ra>
// kernel: tpu_custom_call.1
= control target key start
LH: loop header
LB: loop body
LE: loop exit
PB: predicated region body
PF: predicated region fallthrough
CT: control target
= control target key end

     0   :  { %s1784_s0 = inlined_call_operand.hbm [shape: f32[48], index: 0, kind: input, shape index: {}]   ;;  %s1785_s1 = inlined_call_operand.hbm [shape: f32[8,128], index: 1, kind: input, shape index: {}]   ;;  %s1786_s2 = inlined_call_operand.hbm [shape: f32[3,128], index: 2, kind: output, shape index: {}]  }
   0x1   :  { %1843 = sst [smem:[#allocation31_spill]] %s1786_s2 }
   0x2   :  { %7 = vsyncpa [#allocation5], 0 }
   0x3   :  { %8 = vsyncpa [#allocation3], 0 }
   0x4   :  { %9 = vsyncpa [#allocation4], 0  ;;  %s15_s11 = sshll.u32 %s1784_s0, 4  ;;  %s24_s14 = sshll.u32 %s1785_s1, 4  ;;  %s16_s11 = int_to_ptr.hbm [resolvable:$true] %s15_s11  ;;  %s25_s14 = int_to_ptr.hbm [resolvable:$true] %s24_s14 }
   0x5   :  { %s1039_s15 = smov [#allocation2]   ;;  %s1040_s16 = smov [#allocation6]  }
   0x6   :  { %18 = dma.hbm_to_smem %s16_s11, 16, %s1039_s15, [#allocation5]  }
   0x7   :  { %s26_s17 = sshll.u32 %s1040_s16, 4  ;;  %s27_s17 = int_to_ptr.vmem [resolvable:$true] %s26_s17 }
   0x8   :  { %29 = dma.hbm_to_vmem [thread:$0]  %s25_s14, 128, %s27_s17, [#allocation3]  }
   0x9   :  { %1033 = dma.done.wait [#allocation5], 16  }
   0xa   :  { %1034 = vsyncadd [#allocation5], 4294967280 }
   0xb   :  { %1035 = dma.done.wait [#allocation3], 128  }
   0xc   :  { %1036 = vsyncadd [#allocation3], 4294967168 }
   0xd   :  { %38 = sfence }
   0xe   :  { %s39_s18 = sld [smem:[#allocation2]]  ;;  %v1072_v0 = vld [vmem:[#allocation6 + $0x1] sm:$0x1]  ;;  %v1076_v3 = vld [vmem:[#allocation6 + $0x4] sm:$0x1] }
   0xf   :  { %s900_s0 = sld [smem:[#allocation2 + $0x1]]  ;;  %v91_v1 = vand.u32 2147483647, %v1072_v0  ;;  %v94_v2 = vand.u32 2139095040, %v1072_v0  ;;  %v1080_v6 = vld [vmem:[#allocation6 + $0x3] sm:$0x1] }
  0x10   :  { %v1084_v10 = vld [vmem:[#allocation6 + $0x2] sm:$0x1]  ;;  %v1041_v26 = vmov 683565275   ;;  %v1042_v28 = vmov 2475754826  }
  0x11   :  { %v95_v4 = vshrl.u32 %v94_v2, 23  ;;  %v98_v5 = vand.u32 8388607, %v91_v1  ;;  %v1098_v17 = vand.u32 2147483647, %v1084_v10  ;;  %s1175_s1 = sld [smem:[#allocation2 + $0x3]] }
  0x12   :  { %v1043_v30 = vmov 2131351028   ;;  %v1044_v32 = vmov 2102212464   ;;  %v1045_v34 = vmov 920167782  }
  0x13   :  { %v946_v7 = vadd.s32 4294967169, %v95_v4  ;;  %v99_v8 = vor.u32 8388608, %v98_v5  ;;  %v1046_v42 = vmov 1326507024   ;;  %s1179_s19 = sld [smem:[#allocation2 + $0x9]] }
  0x14   :  { %v1082_v9 = vstv %s39_s18  ;;  %s1181_s20 = sld [smem:[#allocation2 + $0xc]] }
  0x15   :  { %v404_v11 = vmul.f32 %v1082_v9, %v1076_v3  ;;  %v1088_v12 = vstv %s900_s0  ;;  %v101_v13 = vadd.s32 1, %v946_v7  ;;  %v1095_v16 = vshll.u32 %v99_v8, 8  ;;  %s1184_s21 = sld [smem:[#allocation2 + $0xd]] }
  0x16   :  { %v468_v14 = vmul.f32 %v1088_v12, %v1076_v3  ;;  %s1190_s22 = sld [smem:[#allocation2 + $0xe]] }
  0x17   :  { %v1093_v15 = vadd.f32 %v404_v11, %v1080_v6  ;;  %vm102_vm0 = vcmp.gt.s32.totalorder %v101_v13, 0  ;;  %v140_v23 = vand.u32 65535, %v1095_v16  ;;  %v141_v36 = vshrl.u32 %v1095_v16, 16  ;;  %s1192_s23 = sld [smem:[#allocation2 + $0xf]] }
  0x18   :  { %v103_v18 = vsel %vm102_vm0, %v101_v13, 0  ;;  %v1104_v21 = vsub.f32 %v468_v14, %v1080_v6  ;;  %s1194_s24 = sld [smem:[#allocation2 + $0x10]] }
  0x19   :  { %v1101_v19 = vand.u32 2147483647, %v1093_v15  ;;  %v105_v20 = vand.u32 31, %v103_v18  ;;  %v104_v22 = vshrl.u32 %v103_v18, 5  ;;  %1846 = sst [smem:[#allocation11_spill]] %s1179_s19 }
  0x1a   :  { %v1113_v37 = vand.u32 2147483647, %v1104_v21  ;;  %s1197_s25 = sld [smem:[#allocation2 + $0x11]] }
  0x1b   :  { %v1109_v24 = vmax.f32 %v1098_v17, %v1101_v19  ;;  %v106_v25 = vsub.s32 32, %v105_v20  ;;  %v108_v27 = vshll.u32 %v1041_v26, %v105_v20  ;;  %v111_v29 = vshll.u32 %v1042_v28, %v105_v20  ;;  %s1202_s26 = sld [smem:[#allocation2 + $0x12]] }
  0x1c   :  { %v114_v31 = vshll.u32 %v1043_v30, %v105_v20  ;;  %v117_v33 = vshll.u32 %v1044_v32, %v105_v20  ;;  %v120_v35 = vshll.u32 %v1045_v34, %v105_v20  ;;  %vm123_vm1 = vcmp.lt.s32.totalorder %v104_v22, 1  ;;  %s1210_s27 = sld [smem:[#allocation2 + $0x13]] }
  0x1d   :  { %v109_v38 = vshrl.u32 %v1042_v28, %v106_v25  ;;  %v112_v39 = vshrl.u32 %v1043_v30, %v106_v25  ;;  %v115_v40 = vshrl.u32 %v1044_v32, %v106_v25  ;;  %v118_v41 = vshrl.u32 %v1045_v34, %v106_v25  ;;  %s1212_s28 = sld [smem:[#allocation2 + $0x14]] }
  0x1e   :  { %v121_v43 = vshrl.u32 %v1046_v42, %v106_v25  ;;  %vm126_vm2 = vcmp.lt.s32.totalorder %v104_v22, 4  ;;  %964 = vrcp.f32 %v1109_v24  ;;  %v107_v44 = vshrl.u32 %v1041_v26, %v106_v25  ;;  %1847 = sst [smem:[#allocation12_spill]] %s1194_s24 }
  0x1f   :  { %v110_v45 = vor.u32 %v109_v38, %v108_v27  ;;  %v113_v46 = vor.u32 %v112_v39, %v111_v29  ;;  %v116_v47 = vor.u32 %v115_v40, %v114_v31  ;;  %v119_v48 = vor.u32 %v118_v41, %v117_v33  ;;  %s1215_s29 = sld [smem:[#allocation2 + $0x15]] }
  0x20   :  { %v122_v49 = vor.u32 %v121_v43, %v120_v35  ;;  %vm124_vm3 = vcmp.lt.s32.totalorder %v104_v22, 2  ;;  %vm125_vm4 = vcmp.lt.s32.totalorder %v104_v22, 3  ;;  %v419_v53 = vand.u32 2147483647, %v1109_v24  ;;  %s1218_s30 = sld [smem:[#allocation2 + $0x16]] }
  0x21   :  { %v128_v50 = vsel %vm126_vm2, %v116_v47, 2102212464  ;;  %v131_v51 = vsel %vm123_vm1, %v110_v45, %v113_v46  ;;  %v135_v52 = vsel %vm123_vm1, %v113_v46, %v116_v47  ;;  %v132_v54 = vsel %vm126_vm2, %v119_v48, 920167782  ;;  %1848 = sst [smem:[#allocation13_spill]] %s1202_s26 }
  0x22   :  { %v136_v55 = vsel %vm126_vm2, %v122_v49, 1326507024  ;;  %v421_v56 = vand.u32 2147483648, %v1109_v24  ;;  %v1122_v57 = vmax.f32 %v1098_v17, %v1113_v37  ;;  %v127_v58 = vsel %vm123_vm1, %v107_v44, %v110_v45  ;;  %1851 = sst [smem:[#allocation14_spill]] %s1210_s27 }
  0x23   :  { %v129_v59 = vsel %vm125_vm4, %v113_v46, %v128_v50  ;;  %v133_v60 = vsel %vm125_vm4, %v116_v47, %v132_v54  ;;  %v137_v61 = vsel %vm125_vm4, %v119_v48, %v136_v55  ;;  %v408_v4 = vmin.f32 %v1098_v17, %v1101_v19  ;;  %1852 = sst [smem:[#allocation15_spill]] %s1212_s28 }
  0x24   :  { %v1125_v62 = vpop.eup %964  ;;  %v134_v63 = vsel %vm124_vm3, %v131_v51, %v133_v60  ;;  %v138_v2 = vsel %vm124_vm3, %v135_v52, %v137_v61  ;;  %v1132_v13 = vsel %vm124_vm3, %v127_v58, %v129_v59  ;;  %vm415_vm5 = vweird.f32 %v1109_v24  ;;  %s1220_s3 = sld [smem:[#allocation2 + $0x17]] }
  0x25   :  { %v142_v5 = vand.u32 65535, %v138_v2  ;;  %v143_v7 = vshrl.u32 %v138_v2, 16  ;;  %v164_v8 = vand.u32 65535, %v134_v63  ;;  %v165_v11 = vshrl.u32 %v134_v63, 16  ;;  %s1222_s4 = sld [smem:[#allocation2 + $0x18]] }
  0x26   :  { %v422_v14 = vor.u32 1.1754944e-38, %v421_v56  ;;  %966 = vrcp.f32 %v1122_v57  ;;  %v411_v26 = vmul.f32 %v1125_v62, %v1109_v24  ;;  %vm1138_vm6 = vcmp.eq.f32.partialorder %v419_v53, 8.507059e+37  ;;  %1853 = sst [smem:[#allocation16_spill]] %s1218_s30 }
  0x27   :  { %v144_v18 = vmul.u32 %v142_v5, %v140_v23  ;;  %v145_v20 = vmul.u32 %v143_v7, %v140_v23  ;;  %v146_v25 = vmul.u32 %v142_v5, %v141_v36  ;;  %v166_v28 = vmul.u32 %v164_v8, %v140_v23  ;;  %s1225_s5 = sld [smem:[#allocation2 + $0x19]] }
  0x28   :  { %v167_v29 = vmul.u32 %v165_v11, %v140_v23  ;;  %v168_v22 = vmul.u32 %v164_v8, %v141_v36  ;;  %vm416_vm7 = vweird.f32 %v1125_v62  ;;  %v147_v30 = vmul.u32 %v143_v7, %v141_v36  ;;  %s1228_s6 = sld [smem:[#allocation2 + $0x1a]] }
  0x29   :  { %v148_v31 = vshll.u32 %v145_v20, 16  ;;  %v150_v32 = vshll.u32 %v146_v25, 16  ;;  %vm479_vm8 = vweird.f32 %v1122_v57  ;;  %v149_v33 = vshrl.u32 %v145_v20, 16  ;;  %vm417_vm13 = vmor %vm415_vm5, %vm416_vm7  ;;  %s1230_s7 = sld [smem:[#allocation2 + $0x1b]] }
  0x2a   :  { %v169_v34 = vmul.u32 %v165_v11, %v141_v36  ;;  %v170_v35 = vshll.u32 %v167_v29, 16  ;;  %v172_v38 = vshll.u32 %v168_v22, 16  ;;  %v151_v39 = vshrl.u32 %v146_v25, 16  ;;  %1854 = sst [smem:[#allocation17_spill]] %s1220_s3 }
  0x2b   :  { %vm152_vm9 = vc.u32 %v144_v18, %v148_v31  ;;  %v154_v40 = vadd.s32 %v148_v31, %v144_v18  ;;  %v412_v41 = vsub.f32 1.0, %v411_v26  ;;  %v1047_v43 = vmov 0   ;;  %1855 = sst [smem:[#allocation18_spill]] %s1222_s4 }
  0x2c   :  { %v967_v42 = vpop.eup %966  ;;  %v153_v44 = vsel %vm152_vm9, 1, %v1047_v43  ;;  %v171_v23 = vshrl.u32 %v167_v29, 16  ;;  %vm174_vm10 = vc.u32 %v166_v28, %v170_v35  ;;  %v176_v45 = vadd.s32 %v170_v35, %v166_v28  ;;  %s1235_s8 = sld [smem:[#allocation2 + $0x1c]] }
  0x2d   :  { %v155_v46 = vadd.s32 %v153_v44, %v147_v30  ;;  %vm156_vm11 = vc.u32 %v154_v40, %v150_v32  ;;  %v175_v47 = vsel %vm174_vm10, 1, %v1047_v43  ;;  %v413_v48 = vmul.f32 %v1125_v62, %v412_v41  ;;  %1856 = sst [smem:[#allocation19_spill]] %s1225_s5 }
  0x2e   :  { %v157_v49 = vsel %vm156_vm11, 1, %v1047_v43  ;;  %v173_v50 = vshrl.u32 %v168_v22, 16  ;;  %v177_v36 = vadd.s32 %v175_v47, %v169_v34  ;;  %vm178_vm12 = vc.u32 %v176_v45, %v172_v38  ;;  %1857 = sst [smem:[#allocation20_spill]] %s1228_s6 }
  0x2f   :  { %v159_v51 = vadd.s32 %v157_v49, %v155_v46  ;;  %v179_v52 = vsel %vm178_vm12, 1, %v1047_v43  ;;  %v414_v53 = vadd.f32 %v1125_v62, %v413_v48  ;;  %v475_v54 = vmul.f32 %v967_v42, %v1122_v57  ;;  %1858 = sst [smem:[#allocation21_spill]] %s1230_s7 }
  0x30   :  { %v1151_v55 = vadd.s32 %v176_v45, %v172_v38  ;;  %v181_v56 = vadd.s32 %v179_v52, %v177_v36  ;;  %v483_v58 = vand.u32 2147483647, %v1122_v57  ;;  %v485_v59 = vand.u32 2147483648, %v1122_v57  ;;  %s1241_s9 = sld [smem:[#allocation2 + $0x1d]] }
  0x31   :  { %v160_v60 = vadd.s32 %v159_v51, %v149_v33  ;;  %v418_v61 = vsel %vm417_vm13, %v1125_v62, %v414_v53  ;;  %v476_v63 = vsub.f32 1.0, %v475_v54  ;;  %vm480_vm14 = vweird.f32 %v967_v42  ;;  %s1249_s10 = sld [smem:[#allocation2 + $0x1e]] }
  0x32   :  { %v182_v24 = vadd.s32 %v181_v56, %v171_v23  ;;  %v423_v2 = vsel %vm1138_vm6, %v422_v14, %v418_v61  ;;  %v184_v18 = vmul.u32 %v1095_v16, %v1132_v13  ;;  %v472_v20 = vmin.f32 %v1098_v17, %v1113_v37  ;;  %vm481_vm15 = vmor %vm479_vm8, %vm480_vm14  ;;  %1859 = sst [smem:[#allocation22_spill]] %s1235_s8 }
  0x33   :  { %v1158_v5 = vadd.s32 %v160_v60, %v151_v39  ;;  %v1160_v7 = vmul.f32 %v423_v2, %v408_v4  ;;  %v477_v8 = vmul.f32 %v967_v42, %v476_v63  ;;  %v486_v62 = vor.u32 1.1754944e-38, %v485_v59  ;;  %s1258_s11 = sld [smem:[#allocation2 + $0x1f]] }
  0x34   :  { %v183_v11 = vadd.s32 %v182_v24, %v173_v50  ;;  %vm484_vm1 = vcmp.eq.f32.partialorder %v483_v58, 8.507059e+37  ;;  %vm459_vm2 = vcmp.eq.s32.totalorder %v1098_v17, inf  ;;  %vm460_vm3 = vcmp.eq.s32.totalorder %v1101_v19, inf  ;;  %s1263_s12 = sld [smem:[#allocation2 + $0x20]] }
  0x35   :  { %vm186_vm0 = vc.u32 %v1158_v5, %v1151_v55  ;;  %v1172_v14 = vmul.f32 %v1160_v7, %v1160_v7  ;;  %v478_v4 = vadd.f32 %v967_v42, %v477_v8  ;;  %vm1206_vm4 = vmand %vm459_vm2, %vm460_vm3  ;;  %vm93_vm6 = vcmp.lt.s32.totalorder %v1072_v0, 0  ;;  %s1266_s13 = sld [smem:[#allocation2 + $0x21]] }
  0x36   :  { %v187_v25 = vadd.s32 1, %v183_v11  ;;  %v185_v53 = vadd.s32 %v1151_v55, %v1158_v5  ;;  %vm524_vm8 = vcmp.eq.s32.totalorder %v1113_v37, inf  ;;  %1860 = sst [smem:[#allocation23_spill]] %s1241_s9  ;;  %vm1253_vm10 = vcmp.le.f32.partialorder %v91_v1, 0.7853982 }
  0x37   :  { %v426_v26 = vmul.f32 0.002785687, %v1172_v14  ;;  %v482_v16 = vsel %vm481_vm15, %v967_v42, %v478_v4  ;;  %vm1245_vm9 = vmand %vm459_vm2, %vm524_vm8  ;;  %vm449_vm11 = vcmp.lt.s32.totalorder %v1084_v10, 0  ;;  %s1268_s14 = sld [smem:[#allocation2 + $0x22]]  ;;  %vm443_vm12 = vcmp.gt.f32.partialorder %v1101_v19, %v1098_v17 }
  0x38   :  { %v188_v13 = vsel %vm186_vm0, %v187_v25, %v183_v11  ;;  %v487_v27 = vsel %vm484_vm1, %v486_v62, %v482_v16  ;;  %vm446_vm13 = vcmp.lt.f32.partialorder %v1084_v10, 0.0  ;;  %s1273_s15 = sld [smem:[#allocation2 + $0x23]]  ;;  %vm453_vm14 = vcmp.ne.f32.partialorder %v1084_v10, %v1084_v10 }
  0x39   :  { %v189_v57 = vadd.s32 %v188_v13, %v184_v18  ;;  %v427_v28 = vadd.f32 -0.015866, %v426_v26  ;;  %v1177_v29 = vmul.f32 %v487_v27, %v472_v20  ;;  %v1806_v27 = vmov 0.0   ;;  %s1285_s16 = sld [smem:[#allocation2 + $0x24]] }
  0x3a   :  { %vm454_vm15 = vcmp.ne.f32.partialorder %v1093_v15, %v1093_v15  ;;  %vm451_vm0 = vcmp.eq.f32.partialorder %v1093_v15, 0.0  ;;  %s1300_s17 = sld [smem:[#allocation2 + $0x2a]]  ;;  %vm507_vm1 = vcmp.gt.f32.partialorder %v1113_v37, %v1098_v17  ;;  %vm518_vm3 = vcmp.ne.f32.partialorder %v1104_v21, %v1104_v21 }
  0x3b   :  { %v190_v22 = vadd.s32 536870912, %v189_v57  ;;  %v428_v30 = vmul.f32 %v427_v28, %v1172_v14  ;;  %v1188_v31 = vmul.f32 %v1177_v29, %v1177_v29  ;;  %1865 = sst [smem:[#allocation24_spill]] %s1266_s13  ;;  %vm1360_vm2 = vmor %vm453_vm14, %vm454_vm15 }
  0x3c   :  { %s1306_s18 = sld [smem:[#allocation2 + $0x25]] }
  0x3d   :  { %v191_v32 = vshrl.u32 %v190_v22, 30  ;;  %v429_v33 = vadd.f32 0.04247222, %v428_v30  ;;  %v490_v38 = vmul.f32 0.002785687, %v1188_v31  ;;  %s1311_s0 = sld [smem:[#allocation2 + $0x2b]] }
  0x3e   :  { %s1317_s2 = sld [smem:[#allocation2 + $0x26]] }
  0x3f   :  { %v192_v34 = vshll.u32 %v191_v32, 30  ;;  %v430_v35 = vmul.f32 %v429_v33, %v1172_v14  ;;  %v491_v42 = vadd.f32 -0.015866, %v490_v38  ;;  %v215_v49 = vsub.s32 4, %v191_v32  ;;  %s1393_s19 = sld [smem:[#allocation2 + $0x8]] }
  0x41   :  { %v193_v39 = vsub.s32 %v189_v57, %v192_v34  ;;  %v431_v40 = vadd.f32 -0.074975304, %v430_v35  ;;  %v492_v23 = vmul.f32 %v491_v42, %v1188_v31  ;;  %v216_v58 = vsel %vm93_vm6, %v215_v49, %v191_v32 }
  0x42   :  { %v218_v18 = vsel %vm1253_vm10, 0, %v216_v58  ;;  %v1278_v57 = vsel %vm449_vm11, 3.1415927, %v1806_v27  ;;  %v1805_v32 = vmov 0.7853982   ;;  %v464_v34 = vand.u32 2147483648, %v1093_v15 }
  0x43   :  { %vm194_vm5 = vcmp.lt.s32.totalorder %v193_v39, 0  ;;  %v195_v43 = vsub.s32 0, %v193_v39  ;;  %v432_v44 = vmul.f32 %v431_v40, %v1172_v14  ;;  %v493_v48 = vadd.f32 0.04247222, %v492_v23  ;;  %1866 = sst [smem:[#allocation25_spill]] %s1311_s0 }
  0x44   :  { %v235_v20 = vadd.s32 3, %v218_v18  ;;  %v1293_v33 = vsel %vm446_vm13, 2.3561945, %v1805_v32  ;;  %v1296_v38 = vand.u32 3, %v218_v18  ;;  %v1807_v42 = vstv %s1181_s20 }
  0x45   :  { %v196_v45 = vsel %vm194_vm5, %v195_v43, %v193_v39  ;;  %v433_v46 = vadd.f32 0.1064488, %v432_v44  ;;  %v494_v51 = vmul.f32 %v493_v48, %v1188_v31  ;;  %v532_v43 = vstv %s1202_s26  ;;  %s1927_s26 = sld [smem:[#allocation11_spill]] }
  0x46   :  { %v197_v47 = vclz %v196_v45  ;;  %v1287_v22 = vand.u32 3, %v235_v20  ;;  %v535_v44 = vstv %s1222_s4  ;;  %v543_v49 = vstv %s1225_s5  ;;  %s1321_s4 = sld [smem:[#allocation2 + $0x2c]] }
  0x47   :  { %v434_v50 = vmul.f32 %v433_v46, %v1172_v14  ;;  %v495_v54 = vadd.f32 -0.074975304, %v494_v51  ;;  %v1808_v46 = vstv %s1184_s21  ;;  %v556_v58 = vstv %s1215_s29  ;;  %s1326_s5 = sld [smem:[#allocation2 + $0x27]] }
  0x48   :  { %v947_v36 = vadd.s32 4294967294, %v197_v47  ;;  %v540_v47 = vstv %s1210_s27  ;;  %v572_v18 = vstv %s1220_s3  ;;  %s1375_s3 = sld [smem:[#allocation2 + $0x7]]  ;;  %vm515_vm5 = vcmp.eq.f32.partialorder %v1104_v21, 0.0 }
  0x49   :  { %v435_v52 = vadd.f32 -0.14207031, %v434_v50  ;;  %v496_v5 = vmul.f32 %v495_v54, %v1188_v31  ;;  %v546_v50 = vstv %s1190_s22  ;;  %v1809_v54 = vstv %s1192_s23  ;;  %s1883_s27 = sld [smem:[#allocation23_spill]] }
  0x4a   :  { %vm948_vm7 = vcmp.lt.s32.totalorder %v947_v36, 0  ;;  %vm392_vm8 = vcmp.eq.s32.totalorder %v1296_v38, 0  ;;  %vm237_vm11 = vcmp.lt.s32.totalorder %v1287_v22, 2  ;;  %v1831_v17 = vstv %s1393_s19  ;;  %s1909_s22 = sld [smem:[#allocation24_spill]] }
  0x4b   :  { %v200_v56 = vsel %vm948_vm7, 0, %v947_v36  ;;  %v436_v59 = vmul.f32 %v435_v52, %v1172_v14  ;;  %v497_v62 = vadd.f32 0.1064488, %v496_v5  ;;  %v548_v36 = vstv %s1212_s28  ;;  %s1502_s28 = sld [smem:[#allocation2 + $0x2f]] }
  0x4c   :  { %v201_v60 = vsub.s32 32, %v200_v56  ;;  %v202_v61 = vshll.u32 %v193_v39, %v200_v56  ;;  %v205_v63 = vsub.s32 4294967266, %v200_v56  ;;  %vm238_vm7 = vcmp.eq.s32.totalorder %v1287_v22, 0 }
  0x4d   :  { %v437_v2 = vadd.f32 0.19993454, %v436_v59  ;;  %v498_v28 = vmul.f32 %v497_v62, %v1188_v31  ;;  %v559_v59 = vstv %s1230_s7  ;;  %1867 = sst [smem:[#allocation26_spill]] %s1326_s5  ;;  %v1833_v62 = vstv %s1241_s9 }
  0x4e   :  { %v203_v8 = vshrl.u32 %v185_v53, %v201_v60  ;;  %v206_v11 = vadd.s32 127, %v205_v63  ;;  %v551_v53 = vstv %s1228_s6  ;;  %v1810_v60 = vstv %s1194_s24  ;;  %s1333_s6 = sld [smem:[#allocation2 + $0x2d]] }
  0x4f   :  { %v438_v1 = vmul.f32 %v437_v2, %v1172_v14  ;;  %v499_v39 = vadd.f32 -0.14207031, %v498_v28  ;;  %v564_v63 = vstv %s1218_s30  ;;  %v1821_v2 = vstv %s1235_s8  ;;  %s1347_s8 = sld [smem:[#allocation2 + $0x28]] }
  0x50   :  { %v204_v4 = vor.u32 %v203_v8, %v202_v61  ;;  %v207_v25 = vshll.u32 %v206_v11, 23  ;;  %v570_v11 = vstv %s1197_s25  ;;  %s1352_s7 = sld [smem:[#allocation2 + $0x2e]] }
  0x51   :  { %v439_v26 = vadd.f32 -0.33333147, %v438_v1  ;;  %v500_v45 = vmul.f32 %v499_v39, %v1188_v31  ;;  %s1370_s9 = sld [smem:[#allocation2 + $0x2]] }
  0x52   :  { %v208_v16 = vor.u32 4788187, %v207_v25  ;;  %v211_v13 = vcvt.s32.f32 %v204_v4  ;;  %v580_v25 = vstv %s1249_s10  ;;  %1873 = sst [smem:[#allocation30_spill]] %s1375_s3 }
  0x53   :  { %v440_v30 = vmul.f32 %v439_v26, %v1172_v14  ;;  %v528_v14 = vand.u32 2147483648, %v1104_v21  ;;  %v501_v52 = vadd.f32 0.19993454, %v500_v45  ;;  %v582_v26 = vstv %s1285_s16  ;;  %s1487_s30 = sld [smem:[#allocation2 + $0x4]] }
  0x54   :  { %v209_v35 = vand.u32 2147483647, %v208_v16  ;;  %1868 = sst [smem:[#allocation27_spill]] %s1333_s6  ;;  %v1839_v16 = vstv %s1300_s17  ;;  %v1838_v45 = vstv %s1311_s0 }
  0x55   :  { %v441_v40 = vmul.f32 %v440_v30, %v1160_v7  ;;  %v502_v61 = vmul.f32 %v501_v52, %v1188_v31  ;;  %1869 = sst [smem:[#allocation28_spill]] %s1347_s8 }
  0x56   :  { %v212_v23 = vmul.f32 %v211_v13, %v209_v35  ;;  %s1396_s0 = sld [smem:[#allocation2 + $0x29]] }
  0x57   :  { %v442_v48 = vadd.f32 %v441_v40, %v1160_v7  ;;  %v503_v24 = vadd.f32 -0.33333147, %v502_v61  ;;  %1872 = sst [smem:[#allocation29_spill]] %s1370_s9  ;;  %v588_v40 = vstv %s1258_s11  ;;  %v1836_v61 = vstv %s1317_s2 }
  0x58   :  { %v213_v51 = vxor.u32 2147483648, %v212_v23  ;;  %v1819_v4 = vstv %s1370_s9  ;;  %s1880_s9 = sld [smem:[#allocation22_spill]] }
  0x59   :  { %v444_v56 = vsub.f32 1.5707964, %v442_v48  ;;  %v504_v35 = vmul.f32 %v503_v24, %v1188_v31  ;;  %1882 = sst [smem:[#allocation18_spill]] %s1502_s28 }
  0x5a   :  { %v214_v7 = vsel %vm93_vm6, %v213_v51, %v212_v23  ;;  %v590_v23 = vstv %s1306_s18  ;;  %vm395_vm6 = vcmp.eq.s32.totalorder %v1296_v38, 2  ;;  %s1911_s25 = sld [smem:[#allocation26_spill]] }
  0x5b   :  { %v1338_v5 = vsel %vm1253_vm10, %v1072_v0, %v214_v7  ;;  %v445_v8 = vsel %vm443_vm12, %v444_v56, %v442_v48  ;;  %v505_v52 = vmul.f32 %v504_v35, %v1177_v29  ;;  %v1823_v7 = vstv %s1263_s12  ;;  %vm1427_vm10 = vmor %vm453_vm14, %vm518_vm3  ;;  %s1921_s24 = sld [smem:[#allocation27_spill]] }
  0x5c   :  { %v219_v20 = vmul.f32 %v1338_v5, %v1338_v5  ;;  %v447_v1 = vsub.f32 3.1415927, %v445_v8  ;;  %v630_v35 = vstv %s1175_s1  ;;  %vm391_vm12 = vcmp.lt.s32.totalorder %v1296_v38, 2  ;;  %s1928_s29 = sld [smem:[#allocation18_spill]] }
  0x5d   :  { %v506_v19 = vadd.f32 %v505_v52, %v1177_v29  ;;  %v1834_v52 = vstv %s1347_s8  ;;  %v631_v27 = vmul.f32 %v630_v35, %v1084_v10  ;;  %s1885_s8 = sld [smem:[#allocation11_spill]] }
  0x5e   :  { %v220_v13 = vmul.f32 -0.001358992, %v219_v20  ;;  %v227_v28 = vmul.f32 -0.00019511016, %v219_v20  ;;  %v448_v30 = vsel %vm446_vm13, %v447_v1, %v445_v8  ;;  %v1830_v8 = vstv %s1321_s4 }
  0x5f   :  { %v452_v39 = vsel %vm451_vm0, %v1278_v57, %v448_v30  ;;  %v1835_v30 = vstv %s1326_s5  ;;  %v633_v55 = vsub.f32 %v1819_v4, %v631_v27  ;;  %s1536_s5 = sld [smem:[#allocation2 + $0xa]] }
  0x60   :  { %v221_v48 = vadd.f32 0.041655596, %v220_v13  ;;  %v228_v51 = vadd.f32 0.008332121, %v227_v28  ;;  %v456_v31 = vsel %vm1360_vm2, nan, %v452_v39  ;;  %v1820_v28 = vstv %s1266_s13  ;;  %s1884_s13 = sld [smem:[#allocation25_spill]] }
  0x61   :  { %v462_v56 = vsel %vm1206_vm4, %v1293_v33, %v456_v31  ;;  %vm241_vm4 = vcmp.eq.s32.totalorder %v1287_v22, 2 }
  0x62   :  { %v222_v1 = vmul.f32 %v221_v48, %v219_v20  ;;  %v229_v24 = vmul.f32 %v228_v51, %v219_v20  ;;  %v463_v13 = vand.u32 2147483647, %v462_v56  ;;  %v508_v48 = vsub.f32 1.5707964, %v506_v19 }
  0x63   :  { %v1822_v51 = vstv %s1268_s14  ;;  %v635_v56 = vstv %s1375_s3 }
  0x64   :  { %v223_v39 = vadd.f32 -0.4999988, %v222_v1  ;;  %v230_v31 = vadd.f32 -0.16666654, %v229_v24  ;;  %v465_v29 = vor.u32 %v464_v34, %v463_v13  ;;  %v1837_v1 = vstv %s1273_s15 }
  0x65   :  { %v509_v34 = vsel %vm507_vm1, %v508_v48, %v506_v19  ;;  %1886 = sst [smem:[#allocation19_spill]] %s1536_s5 }
  0x66   :  { %v224_v24 = vmul.f32 %v223_v39, %v219_v20  ;;  %v231_v32 = vmul.f32 %v230_v31, %v219_v20  ;;  %v466_v15 = vsub.f32 %v1072_v0, %v465_v29  ;;  %v511_v13 = vsub.f32 3.1415927, %v509_v34 }
  0x68   :  { %v225_v41 = vadd.f32 1.0, %v224_v24  ;;  %v232_v39 = vadd.f32 1.0, %v231_v32  ;;  %v531_v37 = vmul.f32 %v1807_v42, %v466_v15  ;;  %v539_v20 = vmul.f32 %v1808_v46, %v466_v15 }
  0x69   :  { %v512_v19 = vsel %vm446_vm13, %v511_v13, %v509_v34  ;;  %v547_v32 = vmul.f32 %v546_v50, %v466_v15  ;;  %v555_v31 = vmul.f32 %v1809_v54, %v466_v15  ;;  %v563_v29 = vmul.f32 %v1810_v60, %v466_v15 }
  0x6a   :  { %v233_v48 = vmul.f32 %v232_v39, %v1338_v5  ;;  %v242_v24 = vxor.u32 2147483648, %v225_v41  ;;  %v516_v42 = vsel %vm515_vm5, %v1278_v57, %v512_v19  ;;  %v533_v46 = vadd.f32 %v532_v43, %v531_v37 }
  0x6b   :  { %v520_v34 = vsel %vm1427_vm10, nan, %v516_v42  ;;  %v541_v13 = vadd.f32 %v540_v47, %v539_v20  ;;  %v549_v54 = vadd.f32 %v548_v36, %v547_v32  ;;  %v557_v60 = vadd.f32 %v556_v58, %v555_v31 }
  0x6c   :  { %v239_v5 = vxor.u32 2147483648, %v233_v48  ;;  %v526_v57 = vsel %vm1245_vm9, %v1293_v33, %v520_v34  ;;  %v1832_v39 = vstv %s1396_s0  ;;  %v534_v37 = vmax.f32 %v533_v46, 0.0 }
  0x6d   :  { %v527_v42 = vand.u32 2147483647, %v526_v57  ;;  %v542_v20 = vmax.f32 %v541_v13, 0.0  ;;  %v550_v19 = vmax.f32 %v549_v54, 0.0  ;;  %v558_v32 = vmax.f32 %v557_v60, 0.0 }
  0x6e   :  { %v565_v31 = vadd.f32 %v564_v63, %v563_v29  ;;  %v636_v33 = vmul.f32 %v635_v56, %v1084_v10  ;;  %v243_v34 = vsel %vm241_vm4, %v242_v24, %v233_v48  ;;  %v397_v46 = vsel %vm395_vm6, %v242_v24, %v233_v48 }
  0x6f   :  { %v529_v54 = vor.u32 %v528_v14, %v527_v42  ;;  %v536_v60 = vmul.f32 %v535_v44, %v534_v37  ;;  %v240_v27 = vsel %vm238_vm7, %v225_v41, %v239_v5  ;;  %v394_v29 = vsel %vm392_vm8, %v225_v41, %v239_v5 }
  0x70   :  { %v544_v13 = vmul.f32 %v543_v49, %v542_v20  ;;  %v552_v48 = vmul.f32 %v551_v53, %v550_v19  ;;  %v560_v21 = vmul.f32 %v559_v59, %v558_v32  ;;  %v566_v14 = vmax.f32 %v565_v31, 0.0 }
  0x71   :  { %v571_v24 = vmul.f32 %v570_v11, %v466_v15  ;;  %v581_v57 = vmul.f32 %v580_v25, %v529_v54  ;;  %vm234_vm9 = vweird.f32 %v1072_v0  ;;  %v589_v5 = vmul.f32 %v588_v40, %v529_v54 }
  0x72   :  { %v545_v41 = vadd.f32 %v544_v13, %v536_v60  ;;  %v597_v42 = vmul.f32 %v1823_v7, %v529_v54  ;;  %v605_v37 = vmul.f32 %v1820_v28, %v529_v54  ;;  %v568_v20 = vmul.f32 %v1821_v2, %v566_v14  ;;  %v1522_v2 = vld [vmem:[#allocation6] sm:$0x1] }
  0x73   :  { %v573_v19 = vadd.f32 %v572_v18, %v571_v24  ;;  %v583_v15 = vadd.f32 %v582_v26, %v581_v57  ;;  %v613_v32 = vmul.f32 %v1822_v51, %v529_v54  ;;  %v591_v60 = vadd.f32 %v590_v23, %v589_v5 }
  0x74   :  { %v553_v31 = vadd.f32 %v552_v48, %v545_v41  ;;  %v599_v13 = vadd.f32 %v1836_v61, %v597_v42  ;;  %v607_v4 = vadd.f32 %v1835_v30, %v605_v37  ;;  %v621_v57 = vmul.f32 %v1837_v1, %v529_v54 }
  0x75   :  { %v574_v28 = vmax.f32 %v573_v19, 0.0  ;;  %v584_v14 = vmax.f32 %v583_v15, 0.0  ;;  %v615_v24 = vadd.f32 %v1834_v52, %v613_v32  ;;  %v592_v48 = vmax.f32 %v591_v60, 0.0 }
  0x76   :  { %v561_v51 = vadd.f32 %v560_v21, %v553_v31  ;;  %v600_v41 = vmax.f32 %v599_v13, 0.0  ;;  %v608_v7 = vmax.f32 %v607_v4, 0.0  ;;  %v244_v5 = vsel %vm237_vm11, %v240_v27, %v243_v34 }
  0x77   :  { %v576_v42 = vmul.f32 %v1833_v62, %v574_v28  ;;  %v586_v37 = vmul.f32 %v1839_v16, %v584_v14  ;;  %v623_v19 = vadd.f32 %v1832_v39, %v621_v57  ;;  %v594_v15 = vmul.f32 %v1838_v45, %v592_v48 }
  0x78   :  { %v569_v54 = vadd.f32 %v568_v20, %v561_v51  ;;  %v602_v21 = vmul.f32 %v1830_v8, %v600_v41  ;;  %v616_v32 = vmax.f32 %v615_v24, 0.0  ;;  %v398_v22 = vsel %vm391_vm12, %v394_v29, %v397_v46 }
  0x79   :  { %v634_v4 = vmul.f32 %v633_v55, %v1522_v2  ;;  %v637_v28 = vmul.f32 %v636_v33, %v1084_v10  ;;  %v1543_v34 = vstv %s1487_s30  ;;  %v595_v27 = vadd.f32 %v594_v15, %v586_v37  ;;  %s904_s30 = sld [smem:[#allocation2 + $0x5]] }
  0x7a   :  { %v577_v51 = vadd.f32 %v576_v42, %v569_v54  ;;  %v1887_v20 = vstv %s1333_s6  ;;  %v624_v60 = vmax.f32 %v623_v19, 0.0  ;;  %v1549_v13 = vsel %vm234_vm9, nan, %v244_v5  ;;  %s1567_s6 = sld [smem:[#allocation2 + $0x6]] }
  0x7b   :  { %v610_v31 = vmul.f32 %v1887_v20, %v608_v7  ;;  %v1829_v14 = vstv %s1502_s28  ;;  %v639_v38 = vadd.f32 %v1831_v17, %v637_v28  ;;  %v645_v55 = vmul.f32 %v1543_v34, %v1080_v6  ;;  %s1912_s28 = sld [smem:[#allocation28_spill]] }
  0x7c   :  { %v1888_v46 = vstv %s1885_s8  ;;  %v603_v29 = vadd.f32 %v602_v21, %v595_v27  ;;  %v1889_v24 = vstv %s1352_s7  ;;  %v1562_v7 = vsel %vm234_vm9, nan, %v398_v22 }
  0x7d   :  { %v579_v33 = vadd.f32 %v1888_v46, %v577_v51  ;;  %v618_v57 = vmul.f32 %v1889_v24, %v616_v32  ;;  %v640_v48 = vadd.f32 %v639_v38, %v634_v4  ;;  %v626_v5 = vmul.f32 %v1829_v14, %v624_v60 }
  0x7e   :  { %v611_v41 = vadd.f32 %v610_v31, %v603_v29  ;;  %v646_v37 = vmul.f32 %v645_v55, %v1076_v3  ;;  %v652_v0 = vmul.f32 %v1543_v34, %v1084_v10  ;;  %v1828_v21 = vstv %s1536_s5 }
  0x7f   :  { %v642_v42 = vmul.f32 %v579_v33, %v1549_v13  ;;  %v641_v54 = vmul.f32 %v579_v33, %v1562_v7  ;;  %v1579_v31 = vstv %s904_s30  ;;  %s1897_s30 = sld [smem:[#allocation12_spill]] }
  0x80   :  { %1890 = sst [smem:[#allocation22_spill]] %s1567_s6  ;;  %v619_v19 = vadd.f32 %v618_v57, %v611_v41  ;;  %v653_v28 = vmul.f32 %v652_v0, %v1076_v3  ;;  %v1827_v60 = vstv %s1567_s6 }
  0x81   :  { %v643_v15 = vsub.f32 %v640_v48, %v642_v42  ;;  %v657_v51 = vmul.f32 %v641_v54, %v1082_v9  ;;  %s1939_s6 = sld [smem:[#allocation31_spill]] }
  0x82   :  { %v627_v32 = vadd.f32 %v626_v5, %v619_v19 }
  0x83   :  { %v647_v4 = vadd.f32 %v646_v37, %v643_v15 }
  0x84   :  { %v629_v22 = vadd.f32 %v1828_v21, %v627_v32 }
  0x85   :  { %v1583_v38 = vmul.f32 %v1579_v31, %v647_v4 }
  0x86   :  { %v651_v27 = vadd.f32 %v641_v54, %v629_v22  ;;  %v658_v20 = vmul.f32 %v629_v22, %v1088_v12 }
  0x87   :  { %v1594_v24 = vadd.f32 %v1583_v38, %v1084_v10 }
  0x88   :  { %v654_v55 = vsub.f32 %v651_v27, %v653_v28  ;;  %v659_v46 = vsub.f32 %v657_v51, %v658_v20 }
  0x89   :  { %v1612_v10 = vand.u32 2147483647, %v1594_v24  ;;  %vm711_vm12 = vcmp.lt.s32.totalorder %v1594_v24, 0  ;;  %vm715_vm9 = vcmp.ne.f32.partialorder %v1594_v24, %v1594_v24 }
  0x8a   :  { %v1586_v33 = vmul.f32 %v654_v55, %v1579_v31  ;;  %v1590_v29 = vmul.f32 %v1827_v60, %v659_v46 }
  0x8b   :  { %vm721_vm4 = vcmp.eq.s32.totalorder %v1612_v10, inf }
  0x8c   :  { %v1598_v57 = vadd.f32 %v1586_v33, %v1080_v6  ;;  %v1602_v48 = vadd.f32 %v1590_v29, %v1076_v3 }
  0x8e   :  { %v666_v41 = vmul.f32 %v1602_v48, %v1082_v9  ;;  %v729_v5 = vmul.f32 %v1602_v48, %v1088_v12 }
  0x90   :  { %v1609_v42 = vadd.f32 %v666_v41, %v1598_v57  ;;  %v1615_v37 = vsub.f32 %v729_v5, %v1598_v57 }
  0x92   :  { %v1618_v6 = vand.u32 2147483647, %v1609_v42  ;;  %v1621_v3 = vand.u32 2147483647, %v1615_v37 }
  0x94   :  { %v671_v19 = vmax.f32 %v1612_v10, %v1618_v6  ;;  %v734_v54 = vmax.f32 %v1612_v10, %v1621_v3  ;;  %v670_v60 = vmin.f32 %v1612_v10, %v1618_v6  ;;  %vm722_vm6 = vcmp.eq.s32.totalorder %v1618_v6, inf }
  0x95   :  { %vm1633_vm7 = vmand %vm721_vm4, %vm722_vm6  ;;  %vm785_vm8 = vcmp.eq.s32.totalorder %v1621_v3, inf  ;;  %vm705_vm11 = vcmp.gt.f32.partialorder %v1618_v6, %v1612_v10 }
  0x96   :  { %968 = vrcp.f32 %v671_v19  ;;  %vm677_vm13 = vweird.f32 %v671_v19  ;;  %v683_v22 = vand.u32 2147483648, %v671_v19  ;;  %v681_v51 = vand.u32 2147483647, %v671_v19  ;;  %vm1638_vm10 = vmand %vm721_vm4, %vm785_vm8 }
  0x97   :  { %970 = vrcp.f32 %v734_v54  ;;  %v746_v27 = vand.u32 2147483648, %v734_v54  ;;  %vm740_vm15 = vweird.f32 %v734_v54  ;;  %v744_v55 = vand.u32 2147483647, %v734_v54 }
  0x98   :  { %v684_v41 = vor.u32 1.1754944e-38, %v683_v22  ;;  %vm682_vm2 = vcmp.eq.f32.partialorder %v681_v51, 8.507059e+37 }
  0x99   :  { %v747_v14 = vor.u32 1.1754944e-38, %v746_v27  ;;  %vm745_vm5 = vcmp.eq.f32.partialorder %v744_v55, 8.507059e+37 }
  0x9c   :  { %v969_v15 = vpop.eup %968 }
  0x9d   :  { %v971_v0 = vpop.eup %970  ;;  %v673_v32 = vmul.f32 %v969_v15, %v671_v19  ;;  %vm678_vm14 = vweird.f32 %v969_v15 }
  0x9e   :  { %v736_v4 = vmul.f32 %v971_v0, %v734_v54  ;;  %vm741_vm0 = vweird.f32 %v971_v0  ;;  %vm679_vm1 = vmor %vm677_vm13, %vm678_vm14  ;;  %vm716_vm13 = vcmp.ne.f32.partialorder %v1609_v42, %v1609_v42  ;;  %vm768_vm14 = vcmp.gt.f32.partialorder %v1621_v3, %v1612_v10 }
  0x9f   :  { %v674_v28 = vsub.f32 1.0, %v673_v32  ;;  %vm742_vm3 = vmor %vm740_vm15, %vm741_vm0  ;;  %v733_v32 = vmin.f32 %v1612_v10, %v1621_v3  ;;  %vm708_vm15 = vcmp.lt.f32.partialorder %v1594_v24, 0.0  ;;  %vm713_vm0 = vcmp.eq.f32.partialorder %v1609_v42, 0.0 }
  0xa0   :  { %v737_v20 = vsub.f32 1.0, %v736_v4 }
  0xa1   :  { %v675_v46 = vmul.f32 %v969_v15, %v674_v28 }
  0xa2   :  { %v738_v5 = vmul.f32 %v971_v0, %v737_v20 }
  0xa3   :  { %v676_v21 = vadd.f32 %v969_v15, %v675_v46 }
  0xa4   :  { %v739_v19 = vadd.f32 %v971_v0, %v738_v5 }
  0xa5   :  { %v680_v4 = vsel %vm679_vm1, %v969_v15, %v676_v21  ;;  %vm779_vm1 = vcmp.ne.f32.partialorder %v1615_v37, %v1615_v37  ;;  %v972_v15 = vld [vmem:[#allocation6 + $0x1] sm:$0x1] }
  0xa6   :  { %v685_v8 = vsel %vm682_vm2, %v684_v41, %v680_v4  ;;  %v743_v17 = vsel %vm742_vm3, %v971_v0, %v739_v19  ;;  %vm717_vm2 = vmor %vm715_vm9, %vm716_vm13  ;;  %vm776_vm3 = vcmp.eq.f32.partialorder %v1615_v37, 0.0 }
  0xa7   :  { %v686_v54 = vmul.f32 %v685_v8, %v670_v60  ;;  %v748_v28 = vsel %vm745_vm5, %v747_v14, %v743_v17  ;;  %vm780_vm5 = vmor %vm715_vm9, %vm779_vm1 }
  0xa8   :  { %v749_v39 = vmul.f32 %v748_v28, %v733_v32 }
  0xa9   :  { %v687_v22 = vmul.f32 %v686_v54, %v686_v54 }
  0xaa   :  { %v750_v20 = vmul.f32 %v749_v39, %v749_v39 }
  0xab   :  { %v688_v62 = vmul.f32 0.002785687, %v687_v22 }
  0xac   :  { %v751_v52 = vmul.f32 0.002785687, %v750_v20 }
  0xad   :  { %v689_v30 = vadd.f32 -0.015866, %v688_v62  ;;  %v1903_v62 = vstv %s1184_s21 }
  0xae   :  { %v752_v46 = vadd.f32 -0.015866, %v751_v52 }
  0xaf   :  { %v690_v51 = vmul.f32 %v689_v30, %v687_v22 }
  0xb0   :  { %v753_v61 = vmul.f32 %v752_v46, %v750_v20 }
  0xb1   :  { %v691_v27 = vadd.f32 0.04247222, %v690_v51 }
  0xb2   :  { %v754_v21 = vadd.f32 0.04247222, %v753_v61 }
  0xb3   :  { %v692_v1 = vmul.f32 %v691_v27, %v687_v22 }
  0xb4   :  { %v755_v17 = vmul.f32 %v754_v21, %v750_v20 }
  0xb5   :  { %v693_v8 = vadd.f32 -0.074975304, %v692_v1 }
  0xb6   :  { %v756_v60 = vadd.f32 -0.074975304, %v755_v17 }
  0xb7   :  { %v694_v14 = vmul.f32 %v693_v8, %v687_v22 }
  0xb8   :  { %v757_v52 = vmul.f32 %v756_v60, %v750_v20 }
  0xb9   :  { %v695_v30 = vadd.f32 0.1064488, %v694_v14 }
  0xba   :  { %v758_v55 = vadd.f32 0.1064488, %v757_v52 }
  0xbb   :  { %v696_v0 = vmul.f32 %v695_v30, %v687_v22  ;;  %v1895_v30 = vmov 0.0  }
  0xbc   :  { %v759_v61 = vmul.f32 %v758_v55, %v750_v20  ;;  %v712_v6 = vsel %vm711_vm12, 3.1415927, %v1895_v30  ;;  %v726_v55 = vand.u32 2147483648, %v1609_v42 }
  0xbd   :  { %v697_v41 = vadd.f32 -0.14207031, %v696_v0 }
  0xbe   :  { %v760_v32 = vadd.f32 -0.14207031, %v759_v61 }
  0xbf   :  { %v698_v5 = vmul.f32 %v697_v41, %v687_v22 }
  0xc0   :  { %v761_v4 = vmul.f32 %v760_v32, %v750_v20 }
  0xc1   :  { %v699_v19 = vadd.f32 0.19993454, %v698_v5 }
  0xc2   :  { %v762_v28 = vadd.f32 0.19993454, %v761_v4  ;;  %v789_v4 = vand.u32 2147483648, %v1615_v37 }
  0xc3   :  { %v700_v1 = vmul.f32 %v699_v19, %v687_v22 }
  0xc4   :  { %v763_v51 = vmul.f32 %v762_v28, %v750_v20 }
  0xc5   :  { %v701_v46 = vadd.f32 -0.33333147, %v700_v1 }
  0xc6   :  { %v764_v21 = vadd.f32 -0.33333147, %v763_v51 }
  0xc7   :  { %v702_v27 = vmul.f32 %v701_v46, %v687_v22 }
  0xc8   :  { %v765_v17 = vmul.f32 %v764_v21, %v750_v20  ;;  %v1902_v21 = vstv %s1181_s20 }
  0xc9   :  { %v703_v8 = vmul.f32 %v702_v27, %v686_v54  ;;  %v853_v27 = vmul.f32 %v1594_v24, %v630_v35 }
  0xca   :  { %v766_v16 = vmul.f32 %v765_v17, %v749_v39 }
  0xcb   :  { %v704_v45 = vadd.f32 %v703_v8, %v686_v54 }
  0xcc   :  { %v767_v60 = vadd.f32 %v766_v16, %v749_v39 }
  0xcd   :  { %v706_v14 = vsub.f32 1.5707964, %v704_v45 }
  0xce   :  { %v769_v54 = vsub.f32 1.5707964, %v767_v60 }
  0xcf   :  { %v707_v22 = vsel %vm705_vm11, %v706_v14, %v704_v45  ;;  %v1896_v45 = vmov 0.7853982   ;;  %v1904_v14 = vstv %s1192_s23  ;;  %s1910_s23 = sld [smem:[#allocation29_spill]] }
  0xd0   :  { %v709_v20 = vsub.f32 3.1415927, %v707_v22  ;;  %v770_v16 = vsel %vm768_vm14, %v769_v54, %v767_v60  ;;  %v720_v10 = vsel %vm708_vm15, 2.3561945, %v1896_v45 }
  0xd1   :  { %v772_v3 = vsub.f32 3.1415927, %v770_v16 }
  0xd2   :  { %v710_v39 = vsel %vm708_vm15, %v709_v20, %v707_v22  ;;  %v1905_v22 = vstv %s1897_s30 }
  0xd3   :  { %v714_v52 = vsel %vm713_vm0, %v712_v6, %v710_v39  ;;  %v773_v41 = vsel %vm708_vm15, %v772_v3, %v770_v16 }
  0xd4   :  { %v718_v0 = vsel %vm717_vm2, nan, %v714_v52  ;;  %v777_v5 = vsel %vm776_vm3, %v712_v6, %v773_v41  ;;  %v1913_v41 = vstv %s1300_s17 }
  0xd5   :  { %v724_v61 = vsel %vm1633_vm7, %v720_v10, %v718_v0  ;;  %v781_v19 = vsel %vm780_vm5, nan, %v777_v5  ;;  %v1914_v5 = vstv %s1884_s13 }
  0xd6   :  { %v725_v32 = vand.u32 2147483647, %v724_v61  ;;  %v787_v42 = vsel %vm1638_vm10, %v720_v10, %v781_v19 }
  0xd7   :  { %v788_v28 = vand.u32 2147483647, %v787_v42 }
  0xd8   :  { %v727_v1 = vor.u32 %v726_v55, %v725_v32 }
  0xd9   :  { %v790_v51 = vor.u32 %v789_v4, %v788_v28  ;;  %v1918_v28 = vstv %s1880_s9 }
  0xda   :  { %v728_v46 = vsub.f32 %v972_v15, %v727_v1  ;;  %v1917_v1 = vstv %s1268_s14 }
  0xdb   :  { %v822_v30 = vmul.f32 %v790_v51, %v580_v25  ;;  %v827_v6 = vmul.f32 %v790_v51, %v588_v40 }
  0xdc   :  { %v791_v37 = vmul.f32 %v728_v46, %v1902_v21  ;;  %v796_v8 = vmul.f32 %v728_v46, %v1903_v62  ;;  %v801_v17 = vmul.f32 %v728_v46, %v546_v50  ;;  %v806_v60 = vmul.f32 %v728_v46, %v1904_v14 }
  0xdd   :  { %v811_v54 = vmul.f32 %v728_v46, %v1905_v22  ;;  %v816_v20 = vmul.f32 %v728_v46, %v570_v11  ;;  %v823_v25 = vadd.f32 %v822_v30, %v582_v26  ;;  %v1923_v14 = vstv %s1911_s25 }
  0xde   :  { %v792_v35 = vadd.f32 %v791_v37, %v532_v43  ;;  %v797_v16 = vadd.f32 %v796_v8, %v540_v47  ;;  %v802_v39 = vadd.f32 %v801_v17, %v548_v36  ;;  %v807_v50 = vadd.f32 %v806_v60, %v556_v58 }
  0xdf   :  { %v812_v45 = vadd.f32 %v811_v54, %v564_v63  ;;  %v817_v11 = vadd.f32 %v816_v20, %v572_v18  ;;  %v828_v43 = vadd.f32 %v827_v6, %v590_v23  ;;  %v824_v3 = vmax.f32 %v823_v25, 0.0 }
  0xe0   :  { %v793_v40 = vmax.f32 %v792_v35, 0.0  ;;  %v798_v47 = vmax.f32 %v797_v16, 0.0  ;;  %v803_v10 = vmax.f32 %v802_v39, 0.0  ;;  %v808_v36 = vmax.f32 %v807_v50, 0.0 }
  0xe1   :  { %v813_v58 = vmax.f32 %v812_v45, 0.0  ;;  %v829_v63 = vmax.f32 %v828_v43, 0.0  ;;  %v856_v18 = vmul.f32 %v1594_v24, %v635_v56  ;;  %v818_v55 = vmax.f32 %v817_v11, 0.0 }
  0xe2   :  { %v794_v26 = vmul.f32 %v793_v40, %v535_v44  ;;  %v799_v23 = vmul.f32 %v798_v47, %v543_v49  ;;  %v804_v52 = vmul.f32 %v803_v10, %v551_v53  ;;  %v809_v0 = vmul.f32 %v808_v36, %v559_v59 }
  0xe3   :  { %v825_v61 = vmul.f32 %v824_v3, %v1913_v41  ;;  %v830_v32 = vmul.f32 %v829_v63, %v1914_v5  ;;  %v1915_v56 = vstv %s1263_s12  ;;  %v1916_v44 = vstv %s1909_s22 }
  0xe4   :  { %v800_v19 = vadd.f32 %v799_v23, %v794_v26  ;;  %v832_v4 = vmul.f32 %v790_v51, %v1915_v56  ;;  %v837_v42 = vmul.f32 %v790_v51, %v1916_v44  ;;  %v842_v49 = vmul.f32 %v790_v51, %v1917_v1 }
  0xe5   :  { %v814_v15 = vmul.f32 %v813_v58, %v1918_v28  ;;  %v1919_v53 = vstv %s1273_s15  ;;  %v1920_v59 = vstv %s1910_s23  ;;  %v857_v37 = vmul.f32 %v856_v18, %v1594_v24 }
  0xe6   :  { %v847_v46 = vmul.f32 %v790_v51, %v1919_v53  ;;  %v854_v21 = vsub.f32 %v1920_v59, %v853_v27  ;;  %v805_v62 = vadd.f32 %v804_v52, %v800_v19  ;;  %v1922_v8 = vstv %s1317_s2  ;;  %s1932_s2 = sld [smem:[#allocation19_spill]] }
  0xe7   :  { %v833_v17 = vadd.f32 %v832_v4, %v1922_v8  ;;  %v838_v60 = vadd.f32 %v837_v42, %v1923_v14  ;;  %v1924_v22 = vstv %s1912_s28  ;;  %v1925_v20 = vstv %s1883_s27  ;;  %s1050_s27 = smov [#allocation7]  }
  0xe8   :  { %v843_v54 = vadd.f32 %v842_v49, %v1924_v22  ;;  %v819_v30 = vmul.f32 %v818_v55, %v1925_v20  ;;  %v831_v6 = vadd.f32 %v830_v32, %v825_v61  ;;  %v1926_v35 = vstv %s1396_s0  ;;  %s887_s3 = sshll.u32 %s1050_s27, 4  ;;  %s888_s3 = int_to_ptr.vmem [resolvable:$true] %s887_s3 }
  0xe9   :  { %v848_v51 = vadd.f32 %v847_v46, %v1926_v35  ;;  %v810_v16 = vadd.f32 %v809_v0, %v805_v62  ;;  %v834_v27 = vmax.f32 %v833_v17, 0.0  ;;  %v839_v39 = vmax.f32 %v838_v60, 0.0 }
  0xea   :  { %v844_v50 = vmax.f32 %v843_v54, 0.0  ;;  %v855_v45 = vmul.f32 %v854_v21, %v1522_v2  ;;  %v1929_v11 = vstv %s1393_s19  ;;  %v1930_v40 = vstv %s1321_s4  ;;  %s1936_s19 = sld [smem:[#allocation22_spill]] }
  0xeb   :  { %v858_v25 = vadd.f32 %v857_v37, %v1929_v11  ;;  %v815_v43 = vadd.f32 %v814_v15, %v810_v16  ;;  %v835_v47 = vmul.f32 %v834_v27, %v1930_v40  ;;  %v1931_v10 = vstv %s1921_s24 }
  0xec   :  { %v840_v36 = vmul.f32 %v839_v39, %v1931_v10  ;;  %v849_v58 = vmax.f32 %v848_v51, 0.0  ;;  %v1933_v18 = vstv %s1352_s7  ;;  %v863_v23 = vmul.f32 %v1598_v57, %v1543_v34  ;;  %s889_s7 = sshll.u32 %s1939_s6, 4  ;;  %s890_s7 = int_to_ptr.hbm [resolvable:$true] %s889_s7 }
  0xed   :  { %v820_v3 = vadd.f32 %v819_v30, %v815_v43  ;;  %v836_v63 = vadd.f32 %v835_v47, %v831_v6  ;;  %v845_v26 = vmul.f32 %v844_v50, %v1933_v18  ;;  %v1934_v52 = vstv %s1927_s26 }
  0xee   :  { %v1935_v2 = vstv %s1928_s29  ;;  %v859_v61 = vadd.f32 %v858_v25, %v855_v45  ;;  %v869_v5 = vmul.f32 %v1594_v24, %v1543_v34  ;;  %v864_v4 = vmul.f32 %v863_v23, %v1602_v48 }
  0xef   :  { %v821_v0 = vadd.f32 %v820_v3, %v1934_v52  ;;  %v841_v55 = vadd.f32 %v840_v36, %v836_v63  ;;  %v850_v41 = vmul.f32 %v849_v58, %v1935_v2  ;;  %v1937_v57 = vstv %s1932_s2 }
  0xf0   :  { %v870_v28 = vmul.f32 %v869_v5, %v1602_v48  ;;  %v1938_v21 = vstv %s1936_s19 }
  0xf1   :  { %v846_v32 = vadd.f32 %v845_v26, %v841_v55  ;;  %v860_v19 = vmul.f32 %v821_v0, %v1562_v7  ;;  %v861_v56 = vmul.f32 %v821_v0, %v1549_v13 }
  0xf3   :  { %v851_v44 = vadd.f32 %v850_v41, %v846_v32  ;;  %v862_v42 = vsub.f32 %v859_v61, %v861_v56  ;;  %v874_v15 = vmul.f32 %v860_v19, %v1082_v9 }
  0xf5   :  { %v852_v1 = vadd.f32 %v851_v44, %v1937_v57  ;;  %v865_v49 = vadd.f32 %v864_v4, %v862_v42 }
  0xf7   :  { %v866_v53 = vmul.f32 %v865_v49, %v1579_v31  ;;  %v868_v34 = vadd.f32 %v860_v19, %v852_v1  ;;  %v875_v24 = vmul.f32 %v852_v1, %v1088_v12 }
  0xf9   :  { %v867_v7 = vadd.f32 %v866_v53, %v1583_v38  ;;  %v871_v46 = vsub.f32 %v868_v34, %v870_v28  ;;  %v876_v13 = vsub.f32 %v874_v15, %v875_v24 }
  0xfb   :  { %v872_v59 = vmul.f32 %v871_v46, %v1579_v31  ;;  %v877_v37 = vmul.f32 %v876_v13, %v1938_v21  ;;  %879 = vst [vmem:[#allocation7] sm:$0x1] %v867_v7 }
  0xfd   :  { %v873_v9 = vadd.f32 %v872_v59, %v1586_v33  ;;  %v878_v48 = vadd.f32 %v877_v37, %v1590_v29 }
  0xff   :  { %880 = vst [vmem:[#allocation7 + $0x1] sm:$0x1] %v873_v9 }
 0x100   :  { %881 = vst [vmem:[#allocation7 + $0x2] sm:$0x1] %v878_v48 }
 0x101   :  { %892 = dma.vmem_to_hbm [thread:$0]  %s888_s3, 64, %s890_s7, [#allocation4]  }
 0x102   :  { %1037 = dma.done.wait [#allocation4], 64  }
 0x103   :  { %1038 = vsyncadd [#allocation4], 4294967232 }
 0x104   :  { %897 = vsyncpa [#allocation3], 1 }
 0x105   :  { %898 = vsyncpa [#allocation4], 1 }
 0x106   :  { %899 = vsyncpa [#allocation5], 1 }

</bundles_post_ra>
